<compile_context>
chip_gen: v7x
topology: tpu7x:2x2x1
jax: 0.10.0
libtpu: 0.0.40
codegen_flags: <defaults>
</compile_context>

<pallas_src>
import math
from collections import OrderedDict
from functools import partial

import jax
import jax.numpy as jnp
from jax import lax
from jax.experimental import pallas as pl
from jax.experimental.pallas import tpu as pltpu

MID_CHANNELS = 256  # hardcoded intermediate channel count in the PyTorch module


def _rpn_level_kernel(x_ref, w3_ref, b3_ref, wh_ref, bh_ref, reg_ref, obj_ref):
    """One (batch, row-tile) grid step.

    x_ref  : (TH+2, W+2, Cin)  bf16  padded NHWC input row-window (1px halo)
    w3_ref : (9*Cin, 256)      bf16  3x3 conv weight in im2col layout
    b3_ref : (1, 256)          f32
    wh_ref : (256, 6A + A)     bf16  fused 1x1 regression|objectness weight
    bh_ref : (1, 6A + A)       f32
    reg_ref: (6A, TH*W)        f32   channels-first output tile
    obj_ref: (A,  TH*W)        f32
    """
    TH = x_ref.shape[0] - 2
    W = x_ref.shape[1] - 2
    Cin = x_ref.shape[2]
    n_reg = reg_ref.shape[0]

    x = x_ref[...]  # (TH+2, W+2, Cin) bf16

    # im2col: concatenate the 9 shifted windows on the lane (channel) axis so
    # the 3x3 conv becomes ONE MXU matmul with K = 9*Cin.
    # TODO(synk): the dx-shifted slices are sublane-misaligned for W % 16 != 0;
    # a roll-based formulation (pltpu.roll on the conv output) would avoid the
    # hidden relayout copies.
    cols = []
    for dy in range(3):
        for dx in range(3):
            cols.append(x[dy:dy + TH, dx:dx + W, :].reshape(TH * W, Cin))
    patches = jnp.concatenate(cols, axis=-1)          # (TH*W, 9*Cin) bf16

    feat = jnp.dot(patches, w3_ref[...], preferred_element_type=jnp.float32)
    feat = feat + b3_ref[...]                          # (TH*W, 256) f32

    heads = jnp.dot(feat.astype(wh_ref.dtype), wh_ref[...],
                    preferred_element_type=jnp.float32)
    heads = heads + bh_ref[...]                        # (TH*W, 6A+A) f32

    # Channels-first store: transpose only the small head result so the stored
    # last dim is the lane-dense flattened spatial dim.
    heads_cf = heads.T                                 # (6A+A, TH*W)
    reg_ref[...] = heads_cf[:n_reg, :].astype(reg_ref.dtype)
    obj_ref[...] = heads_cf[n_reg:, :].astype(obj_ref.dtype)


def _choose_tile_rows(H, W, target_pixels=2048):
    """Row-tile height TH: whole image for small levels, else a TH such that
    TH*W is a multiple of 128 (lane-aligned output tiles) and TH*W is roughly
    `target_pixels` (bounds the VMEM working set per grid step)."""
    if H * W <= 2 * target_pixels:
        return H
    base = 128 // math.gcd(W, 128)        # smallest TH with (TH*W) % 128 == 0
    th = max(1, target_pixels // W)
    th = max(base, (th // base) * base)
    return min(th, H)


@partial(jax.jit, static_argnames=("tile_rows", "compute_dtype"))
def rpn_level_forward(x_nchw, params, tile_rows=None, compute_dtype=jnp.bfloat16):
    """One FPN level of OrientedRPN.  x_nchw: (N, Cin, H, W) -> NCHW outputs."""
    w3, b3, wr, br, wo, bo = (params['w3'], params['b3'], params['wr'],
                              params['br'], params['wo'], params['bo'])
    N, Cin, H, W = x_nchw.shape
    A6 = wr.shape[1]
    A = wo.shape[1]
    NH = A6 + A
    out_dtype = x_nchw.dtype

    TH = _choose_tile_rows(H, W) if tile_rows is None else int(tile_rows)
    TH = min(TH, H)
    Hpad = pl.cdiv(H, TH) * TH
    nH = Hpad // TH
    assert nH == 1 or (TH * W) % 128 == 0, (
        "row tile must give lane-aligned (multiple-of-128) output tiles")

    # --- fused XLA preprocessing (one pass over the input):
    # NCHW -> NHWC, cast to bf16, 1px 'same' halo + bottom pad to Hpad, and
    # unfold into overlapping row windows so the kernel's input blocks become
    # plain non-overlapping BlockSpec tiles (auto double-buffered by Pallas).
    x_nhwc = jnp.transpose(x_nchw, (0, 2, 3, 1)).astype(compute_dtype)
    x_pad = jnp.pad(x_nhwc, ((0, 0), (1, 1 + Hpad - H), (1, 1), (0, 0)))
    row_idx = jnp.arange(nH)[:, None] * TH + jnp.arange(TH + 2)[None, :]
    x_win = x_pad[:, row_idx]                     # (N, nH, TH+2, W+2, Cin)

    # Weights: im2col 3x3 weight + fused 1x1 heads; bf16 operands, f32 biases.
    w3_mat = w3.reshape(9 * Cin, MID_CHANNELS).astype(compute_dtype)
    wh = jnp.concatenate([wr, wo], axis=1).astype(compute_dtype)   # (256, 6A+A)
    bh = jnp.concatenate([br, bo], axis=1).astype(jnp.float32)     # (1, 6A+A)
    b3f = b3.astype(jnp.float32)

    reg_flat, obj_flat = pl.pallas_call(
        _rpn_level_kernel,
        out_shape=(jax.ShapeDtypeStruct((N, A6, Hpad * W), out_dtype),
                   jax.ShapeDtypeStruct((N, A, Hpad * W), out_dtype)),
        grid_spec=pltpu.PrefetchScalarGridSpec(
            num_scalar_prefetch=0,
            grid=(N, nH),
            in_specs=[
                pl.BlockSpec((None, None, TH + 2, W + 2, Cin),
                             lambda n, h: (n, h, 0, 0, 0)),
                pl.BlockSpec((9 * Cin, MID_CHANNELS), lambda n, h: (0, 0)),
                pl.BlockSpec((1, MID_CHANNELS), lambda n, h: (0, 0)),
                pl.BlockSpec((MID_CHANNELS, NH), lambda n, h: (0, 0)),
                pl.BlockSpec((1, NH), lambda n, h: (0, 0)),
            ],
            out_specs=[
                pl.BlockSpec((None, A6, TH * W), lambda n, h: (n, 0, h)),
                pl.BlockSpec((None, A, TH * W), lambda n, h: (n, 0, h)),
            ],
        ),
        compiler_params=pltpu.CompilerParams(
            dimension_semantics=("parallel", "parallel"),
            vmem_limit_bytes=48 * 1024 * 1024,
        ),
    )(x_win, w3_mat, b3f, wh, bh)

    # NCHW outputs: free reshape + crop of padded rows; no output transpose.
    reg = reg_flat.reshape(N, A6, Hpad, W)[:, :, :H, :]
    obj = obj_flat.reshape(N, A, Hpad, W)[:, :, :H, :]
    return {'anchor_offsets': reg, 'objectness_scores': obj}


def init_params(key, fpn_level_num, fpn_channels, num_anchors):
    """Deterministic synthetic parameters matching the module's shapes."""
    params = []
    for i in range(fpn_level_num):
        k = jax.random.fold_in(key, i)
        k1, k2, k3, k4, k5, k6 = jax.random.split(k, 6)
        params.append({
            'w3': 0.05 * jax.random.normal(k1, (3, 3, fpn_channels, MID_CHANNELS), jnp.float32),
            'b3': 0.05 * jax.random.normal(k2, (1, MID_CHANNELS), jnp.float32),
            'wr': 0.05 * jax.random.normal(k3, (MID_CHANNELS, 6 * num_anchors), jnp.float32),
            'br': 0.05 * jax.random.normal(k4, (1, 6 * num_anchors), jnp.float32),
            'wo': 0.05 * jax.random.normal(k5, (MID_CHANNELS, num_anchors), jnp.float32),
            'bo': 0.05 * jax.random.normal(k6, (1, num_anchors), jnp.float32),
        })
    return params


class OrientedRPNPallas:
    """Mirror of the PyTorch OrientedRPN forward, with Pallas per-level kernels."""

    def __init__(self, cfg, key):
        self.fpn_level_num = cfg.get('fpn_level_num', 5)
        self.fpn_channels = cfg.get('fpn_channels', 256)
        self.num_anchors = cfg.get('num_anchors', 3)
        self.params = init_params(key, self.fpn_level_num,
                                  self.fpn_channels, self.num_anchors)

    def forward_single(self, x, level_idx):
        return rpn_level_forward(x, self.params[level_idx])

    def __call__(self, x):
        if isinstance(x, (dict, OrderedDict)):
            out = OrderedDict()
            for idx, (k, v) in enumerate(x.items()):
                out[k] = self.forward_single(v, idx)
            return out
        assert self.fpn_level_num == 1
        return self.forward_single(x, 0)


# --- pure-JAX reference (f32 lax convs) for correctness checking -------------
def rpn_level_ref(x_nchw, p):
    w3_oihw = jnp.transpose(p['w3'], (3, 2, 0, 1))
    feat = lax.conv_general_dilated(
        x_nchw, w3_oihw, (1, 1), 'SAME',
        dimension_numbers=('NCHW', 'OIHW', 'NCHW')) + p['b3'].reshape(1, -1, 1, 1)
    wr = jnp.transpose(p['wr'], (1, 0))[:, :, None, None]
    reg = lax.conv_general_dilated(
        feat, wr, (1, 1), 'SAME',
        dimension_numbers=('NCHW', 'OIHW', 'NCHW')) + p['br'].reshape(1, -1, 1, 1)
    wo = jnp.transpose(p['wo'], (1, 0))[:, :, None, None]
    obj = lax.conv_general_dilated(
        feat, wo, (1, 1), 'SAME',
        dimension_numbers=('NCHW', 'OIHW', 'NCHW')) + p['bo'].reshape(1, -1, 1, 1)
    return {'anchor_offsets': reg, 'objectness_scores': obj}


def _check_close(got, want, atol=5e-2, rtol=5e-2, rel_l2=2e-2):
    # Tolerances loosened vs f32 reference because MXU operands are bf16
    # (accumulation stays f32).
    if got.shape != want.shape or got.dtype != want.dtype:
        return False
    close = bool(jnp.allclose(got, want, atol=atol, rtol=rtol))
    rel = float(jnp.linalg.norm((got - want).astype(jnp.float32)) /
                (jnp.linalg.norm(want.astype(jnp.float32)) + 1e-9))
    return close and rel < rel_l2


if __name__ == "__main__":
    key = jax.random.PRNGKey(0)
    cfg = {'fpn_level_num': 2, 'fpn_channels': 32, 'num_anchors': 3}
    model = OrientedRPNPallas(cfg, jax.random.fold_in(key, 100))

    # Small multi-level FPN input (NCHW, like the PyTorch module expects).
    kx0, kx1, kx2 = jax.random.split(key, 3)
    x = OrderedDict()
    x['p2'] = jax.random.normal(kx0, (2, cfg['fpn_channels'], 16, 16), jnp.float32)
    x['p3'] = jax.random.normal(kx1, (2, cfg['fpn_channels'], 8, 8), jnp.float32)

    out = model(x)
    jax.block_until_ready(out)

    ok = True
    for idx, (lvl, xi) in enumerate(x.items()):
        ref = rpn_level_ref(xi, model.params[idx])
        for name in ('anchor_offsets', 'objectness_scores'):
            ok &= _check_close(out[lvl][name], ref[name])

    # Also exercise the multi-row-tile + height-crop path (H=12, TH=8 -> nH=2).
    x_odd = jax.random.normal(kx2, (2, cfg['fpn_channels'], 12, 16), jnp.float32)
    got = rpn_level_forward(x_odd, model.params[0], tile_rows=8)
    jax.block_until_ready(got)
    ref = rpn_level_ref(x_odd, model.params[0])
    for name in ('anchor_offsets', 'objectness_scores'):
        ok &= _check_close(got[name], ref[name])

    assert ok, "Pallas output mismatch vs reference"
    print("KERNEL_OK")
</pallas_src>

<mosaic_0001>
module attributes {stable_mosaic.version = 11 : i64} {
  func.func @_rpn_level_kernel(%arg0: i32, %arg1: i32, %arg2: memref<1x1x18x18x32xbf16, #tpu.memory_space<vmem>>, %arg3: memref<288x256xbf16, #tpu.memory_space<vmem>>, %arg4: memref<1x256xf32, #tpu.memory_space<vmem>>, %arg5: memref<256x21xbf16, #tpu.memory_space<vmem>>, %arg6: memref<1x21xf32, #tpu.memory_space<vmem>>, %arg7: memref<1x18x256xf32, #tpu.memory_space<vmem>>, %arg8: memref<1x3x256xf32, #tpu.memory_space<vmem>>) attributes {dimension_semantics = [#tpu.dimension_semantics<parallel>, #tpu.dimension_semantics<parallel>], iteration_bounds = array<i64: 2, 1>, scalar_prefetch = 0 : i64, scratch_operands = 0 : i64, tpu.core_type = #tpu.core_type<tc>, window_params = [{transform_indices = @transform_0, window_bounds = array<i64: 1, 1, 18, 18, 32>}, {pipeline_mode = #tpu.pipeline_mode<synchronous>, transform_indices = @transform_1, window_bounds = array<i64: 288, 256>}, {pipeline_mode = #tpu.pipeline_mode<synchronous>, transform_indices = @transform_2, window_bounds = array<i64: 1, 256>}, {pipeline_mode = #tpu.pipeline_mode<synchronous>, transform_indices = @transform_3, window_bounds = array<i64: 256, 21>}, {pipeline_mode = #tpu.pipeline_mode<synchronous>, transform_indices = @transform_4, window_bounds = array<i64: 1, 21>}, {transform_indices = @transform_5, window_bounds = array<i64: 1, 18, 256>}, {transform_indices = @transform_6, window_bounds = array<i64: 1, 3, 256>}]} {
    %c0 = arith.constant 0 : index
    %c0_0 = arith.constant 0 : index
    %c0_1 = arith.constant 0 : index
    %c0_2 = arith.constant 0 : index
    %c0_3 = arith.constant 0 : index
    %0 = vector.load %arg2[%c0, %c0_0, %c0_1, %c0_2, %c0_3] : memref<1x1x18x18x32xbf16, #tpu.memory_space<vmem>>, vector<1x1x18x18x32xbf16>
    %1 = vector.shape_cast %0 : vector<1x1x18x18x32xbf16> to vector<18x18x32xbf16>
    %2 = vector.extract_strided_slice %1 {offsets = [0, 0, 0], sizes = [16, 16, 32], strides = [1, 1, 1]} : vector<18x18x32xbf16> to vector<16x16x32xbf16>
    %3 = vector.shape_cast %2 : vector<16x16x32xbf16> to vector<256x32xbf16>
    %4 = vector.extract_strided_slice %1 {offsets = [0, 1, 0], sizes = [16, 16, 32], strides = [1, 1, 1]} : vector<18x18x32xbf16> to vector<16x16x32xbf16>
    %5 = vector.shape_cast %4 : vector<16x16x32xbf16> to vector<256x32xbf16>
    %6 = vector.extract_strided_slice %1 {offsets = [0, 2, 0], sizes = [16, 16, 32], strides = [1, 1, 1]} : vector<18x18x32xbf16> to vector<16x16x32xbf16>
    %7 = vector.shape_cast %6 : vector<16x16x32xbf16> to vector<256x32xbf16>
    %8 = vector.extract_strided_slice %1 {offsets = [1, 0, 0], sizes = [16, 16, 32], strides = [1, 1, 1]} : vector<18x18x32xbf16> to vector<16x16x32xbf16>
    %9 = vector.shape_cast %8 : vector<16x16x32xbf16> to vector<256x32xbf16>
    %10 = vector.extract_strided_slice %1 {offsets = [1, 1, 0], sizes = [16, 16, 32], strides = [1, 1, 1]} : vector<18x18x32xbf16> to vector<16x16x32xbf16>
    %11 = vector.shape_cast %10 : vector<16x16x32xbf16> to vector<256x32xbf16>
    %12 = vector.extract_strided_slice %1 {offsets = [1, 2, 0], sizes = [16, 16, 32], strides = [1, 1, 1]} : vector<18x18x32xbf16> to vector<16x16x32xbf16>
    %13 = vector.shape_cast %12 : vector<16x16x32xbf16> to vector<256x32xbf16>
    %14 = vector.extract_strided_slice %1 {offsets = [2, 0, 0], sizes = [16, 16, 32], strides = [1, 1, 1]} : vector<18x18x32xbf16> to vector<16x16x32xbf16>
    %15 = vector.shape_cast %14 : vector<16x16x32xbf16> to vector<256x32xbf16>
    %16 = vector.extract_strided_slice %1 {offsets = [2, 1, 0], sizes = [16, 16, 32], strides = [1, 1, 1]} : vector<18x18x32xbf16> to vector<16x16x32xbf16>
    %17 = vector.shape_cast %16 : vector<16x16x32xbf16> to vector<256x32xbf16>
    %18 = vector.extract_strided_slice %1 {offsets = [2, 2, 0], sizes = [16, 16, 32], strides = [1, 1, 1]} : vector<18x18x32xbf16> to vector<16x16x32xbf16>
    %19 = vector.shape_cast %18 : vector<16x16x32xbf16> to vector<256x32xbf16>
    %20 = tpu.concatenate %3, %5, %7, %9, %11, %13, %15, %17, %19 in 1 : vector<256x32xbf16>, vector<256x32xbf16>, vector<256x32xbf16>, vector<256x32xbf16>, vector<256x32xbf16>, vector<256x32xbf16>, vector<256x32xbf16>, vector<256x32xbf16>, vector<256x32xbf16> -> vector<256x288xbf16>
    %c0_4 = arith.constant 0 : index
    %c0_5 = arith.constant 0 : index
    %21 = vector.load %arg3[%c0_4, %c0_5] : memref<288x256xbf16, #tpu.memory_space<vmem>>, vector<288x256xbf16>
    %cst = arith.constant dense<0.000000e+00> : vector<256x256xf32>
    %22 = tpu.matmul %20, %21, %cst {dimension_numbers = #tpu.dot_dimension_numbers<[1], [0], [0], [1], [0, 0, 1, 1], [], []>} : vector<256x288xbf16>, vector<288x256xbf16>, vector<256x256xf32> -> vector<256x256xf32>
    %c0_6 = arith.constant 0 : index
    %c0_7 = arith.constant 0 : index
    %23 = vector.load %arg4[%c0_6, %c0_7] : memref<1x256xf32, #tpu.memory_space<vmem>>, vector<1x256xf32>
    %24 = vector.broadcast %23 : vector<1x256xf32> to vector<256x256xf32>
    %25 = arith.addf %22, %24 : vector<256x256xf32>
    %26 = arith.truncf %25 : vector<256x256xf32> to vector<256x256xbf16>
    %c0_8 = arith.constant 0 : index
    %c0_9 = arith.constant 0 : index
    %27 = vector.load %arg5[%c0_8, %c0_9] : memref<256x21xbf16, #tpu.memory_space<vmem>>, vector<256x21xbf16>
    %cst_10 = arith.constant dense<0.000000e+00> : vector<256x21xf32>
    %28 = tpu.matmul %26, %27, %cst_10 {dimension_numbers = #tpu.dot_dimension_numbers<[1], [0], [0], [1], [0, 0, 1, 1], [], []>} : vector<256x256xbf16>, vector<256x21xbf16>, vector<256x21xf32> -> vector<256x21xf32>
    %c0_11 = arith.constant 0 : index
    %c0_12 = arith.constant 0 : index
    %29 = vector.load %arg6[%c0_11, %c0_12] : memref<1x21xf32, #tpu.memory_space<vmem>>, vector<1x21xf32>
    %30 = vector.broadcast %29 : vector<1x21xf32> to vector<256x21xf32>
    %31 = arith.addf %28, %30 : vector<256x21xf32>
    %32 = tpu.transpose %31, [1, 0] : vector<256x21xf32> -> vector<21x256xf32>
    %33 = vector.extract_strided_slice %32 {offsets = [0, 0], sizes = [18, 256], strides = [1, 1]} : vector<21x256xf32> to vector<18x256xf32>
    %c0_13 = arith.constant 0 : index
    %c0_14 = arith.constant 0 : index
    %c0_15 = arith.constant 0 : index
    %34 = vector.load %arg7[%c0_13, %c0_14, %c0_15] : memref<1x18x256xf32, #tpu.memory_space<vmem>>, vector<1x18x256xf32>
    %35 = vector.shape_cast %34 : vector<1x18x256xf32> to vector<18x256xf32>
    %36 = vector.shape_cast %33 : vector<18x256xf32> to vector<1x18x256xf32>
    tpu.vector_store %arg7[%c0_13, %c0_14, %c0_15], %36 {strides = array<i32>} : memref<1x18x256xf32, #tpu.memory_space<vmem>>, vector<1x18x256xf32>,
    %37 = vector.extract_strided_slice %32 {offsets = [18, 0], sizes = [3, 256], strides = [1, 1]} : vector<21x256xf32> to vector<3x256xf32>
    %c0_16 = arith.constant 0 : index
    %c0_17 = arith.constant 0 : index
    %c0_18 = arith.constant 0 : index
    %38 = vector.load %arg8[%c0_16, %c0_17, %c0_18] : memref<1x3x256xf32, #tpu.memory_space<vmem>>, vector<1x3x256xf32>
    %39 = vector.shape_cast %38 : vector<1x3x256xf32> to vector<3x256xf32>
    %40 = vector.shape_cast %37 : vector<3x256xf32> to vector<1x3x256xf32>
    tpu.vector_store %arg8[%c0_16, %c0_17, %c0_18], %40 {strides = array<i32>} : memref<1x3x256xf32, #tpu.memory_space<vmem>>, vector<1x3x256xf32>,
    return
  }
  func.func @transform_0(%arg0: i32, %arg1: i32) -> (i32, i32, i32, i32, i32) {
    %c0_i32 = arith.constant 0 : i32
    %c0_i32_0 = arith.constant 0 : i32
    %c0_i32_1 = arith.constant 0 : i32
    %c0_i32_2 = arith.constant 0 : i32
    return %arg0, %arg1, %c0_i32, %c0_i32_0, %c0_i32_1 : i32, i32, i32, i32, i32
  }
  func.func @transform_1(%arg0: i32, %arg1: i32) -> (i32, i32) {
    %c0_i32 = arith.constant 0 : i32
    %c0_i32_0 = arith.constant 0 : i32
    %c0_i32_1 = arith.constant 0 : i32
    return %c0_i32, %c0_i32_0 : i32, i32
  }
  func.func @transform_2(%arg0: i32, %arg1: i32) -> (i32, i32) {
    %c0_i32 = arith.constant 0 : i32
    %c0_i32_0 = arith.constant 0 : i32
    %c0_i32_1 = arith.constant 0 : i32
    return %c0_i32, %c0_i32_0 : i32, i32
  }
  func.func @transform_3(%arg0: i32, %arg1: i32) -> (i32, i32) {
    %c0_i32 = arith.constant 0 : i32
    %c0_i32_0 = arith.constant 0 : i32
    %c0_i32_1 = arith.constant 0 : i32
    return %c0_i32, %c0_i32_0 : i32, i32
  }
  func.func @transform_4(%arg0: i32, %arg1: i32) -> (i32, i32) {
    %c0_i32 = arith.constant 0 : i32
    %c0_i32_0 = arith.constant 0 : i32
    %c0_i32_1 = arith.constant 0 : i32
    return %c0_i32, %c0_i32_0 : i32, i32
  }
  func.func @transform_5(%arg0: i32, %arg1: i32) -> (i32, i32, i32) {
    %c0_i32 = arith.constant 0 : i32
    %c0_i32_0 = arith.constant 0 : i32
    return %arg0, %c0_i32, %arg1 : i32, i32, i32
  }
  func.func @transform_6(%arg0: i32, %arg1: i32) -> (i32, i32, i32) {
    %c0_i32 = arith.constant 0 : i32
    %c0_i32_0 = arith.constant 0 : i32
    return %arg0, %c0_i32, %arg1 : i32, i32, i32
  }
}

</mosaic_0001>

<bundles_post_ra>
// kernel: rpn_level_forward.1
= control target key start
LH: loop header
LB: loop body
LE: loop exit
PB: predicated region body
PF: predicated region fallthrough
CT: control target
= control target key end

     0   :  { %s3393_s21 = smov 0   ;;  %s3395_s22 = smov 0   ;;  %s4954_s0 = inlined_call_operand.vmem [shape: bf16[2,1,18,18,32], index: 0, kind: input, shape index: {}]   ;;  %s4955_s1 = inlined_call_operand.vmem [shape: bf16[288,256], index: 1, kind: input, shape index: {}]   ;;  %s4956_s2 = inlined_call_operand.vmem [shape: f32[1,256], index: 2, kind: input, shape index: {}]   ;;  %s4957_s3 = inlined_call_operand.vmem [shape: bf16[256,21], index: 3, kind: input, shape index: {}]   ;;  %s4958_s4 = inlined_call_operand.vmem [shape: f32[1,21], index: 4, kind: input, shape index: {}]   ;;  %s4959_s5 = inlined_call_operand.vmem [shape: f32[2,18,256], index: 5, kind: output, shape index: {0}]   ;;  %s4960_s6 = inlined_call_operand.vmem [shape: f32[2,3,256], index: 6, kind: output, shape index: {1}]  }
   0x1   :  { %s3397_s23 = smov 0  }
   0x2 LB: > { %s29_s24 = sadd.s32 1, %s3348_s22  ;;  %p2816_p0 = scmp.ge.s32.totalorder %s3352_s23, 1  ;;  %s3352_s23 = sphi %s3397_s23, %s17_s23   ;;  %s3348_s22 = sphi %s3395_s22, %s5003_s22   ;;  %s3344_s21 = sphi %s3393_s21, %s5002_s21  }
   0x3   : > { %p31_p1 = scmp.ge.s32.totalorder %s29_s24, 2  ;;  %p237_p2 = scmp.lt.s32.totalorder %s3352_s23, 3 }
   0x5   : > { %s5005_s24 = smov (%p31_p1, %s29_s24), 0  ;;  %p238_p3 = pnand %p2816_p0, %p237_p2 }
   0x7   : > { %241 = sbr.rel (%p238_p3) target bundleno = 988 (0x3dc), region = 40 }
   0xe   : > { %p284_p4 = scmp.lt.s32.totalorder %s3344_s21, 1  ;;  %v3247_v0 = vld [vmem:[%s4955_s1 + $0x4] ss:$8 sps:$4 sm:$0xff]   ;;  %v3249_v1 = vld [vmem:[%s4955_s1] ss:$8 sps:$4 sm:$0xff]   ;;  %vm803_vm0 = vcmask 1042432  }
   0xf   : > { %v3250_v2 = vld [vmem:[%s4955_s1 + $0x14] ss:$8 sps:$4 sm:$0xff]   ;;  %1875 = vmatprep.subr.bf16.mxu0 %v3247_v0  ;;  %v3252_v3 = vld [vmem:[%s4955_s1 + $0x10] ss:$8 sps:$4 sm:$0xff]   ;;  %vm804_vm1 = vcmask 1046532   ;;  %s3354_s19 = smov 64  }
  0x10   : > { %s5007_s21 = smov (!%p284_p4, %s3344_s21), 1  ;;  %1876 = vmatpush1.bf16.msra.mxu0 %v3249_v1  ;;  %v3254_v4 = vld [vmem:[%s4955_s1 + $0x24] ss:$8 sps:$4 sm:$0xff]   ;;  %v3256_v8 = vld [vmem:[%s4955_s1 + $0x20] ss:$8 sps:$4 sm:$0xff]   ;;  %vm3477_vm4 = vmor %vm803_vm0, %vm804_vm1  ;;  %s3355_s26 = smov 96  }
  0x11   : > { %s3210_s7 = smul.u32 216, %s5007_s21  ;;  %1877 = vmatprep.subr.bf16.mxu0 %v3250_v2  ;;  %v3257_v14 = vld [vmem:[%s4955_s1 + $0x34] ss:$8 sps:$4 sm:$0xff]   ;;  %vm368_vm2 = vsmask.f32 3328  ;;  %s3356_s27 = smov 32  }
  0x12   : > { %vm369_vm3 = vsmask.f32 7440  ;;  %v3259_v30 = vld [vmem:[%s4955_s1 + $0x30] ss:$8 sps:$4 sm:$0xff]   ;;  %vm1340_vm6 = vcmask 261120   ;;  %vm1389_vm7 = vcmask 523264  }
  0x13   : > { %s3429_s12 = scalar_lea.vmem %s4954_s0, %s3210_s7  ;;  %vm3521_vm5 = vmor %vm368_vm2, %vm369_vm3  ;;  %vm1422_vm8 = vcmask 785408   ;;  %s3211_s8 = smul.u32 48, %s5007_s21  ;;  %vm2663_vm9 = vcmask 1041408   ;;  %vm2664_vm10 = vcmask 1045508  }
  0x14   : > { %v3435_v5 = vld [vmem:[%s3429_s12 + $0x18] sm:$0xf]  ;;  %v3438_v6 = vld [vmem:[%s3429_s12 + $0x1c] sm:$0xf]  ;;  %v3441_v7 = vld [vmem:[%s3429_s12 + $0x24] sm:$0xf]  ;;  %1878 = vmatpush1.bf16.msra.mxu0 %v3252_v3 }
  0x15   : > { %v433_v9 = vshrl.u32 %v3438_v6, 16  ;;  %v3449_v10 = vcombine.low %v3435_v5, %v3438_v6  ;;  %v420_v11 = vshrl.u32 %v3435_v5, 16  ;;  %v423_v12 = vshll.u32 %v3435_v5, 16  ;;  %v3454_v13 = vld [vmem:[%s3429_s12 + $0x28] sm:$0xf]  ;;  %1879 = vmatprep.subr.bf16.mxu0 %v3254_v4  ;;  %s301_s11 = scalar_lea.vmem %s4959_s5, %s3211_s8  ;;  %vm2665_vm11 = vmor %vm2663_vm9, %vm2664_vm10 }
  0x16   : > { %v457_v15 = vshrl.u32 %v3454_v13, 16  ;;  %v3462_v16 = vcombine.low %v3441_v7, %v3454_v13  ;;  %v444_v17 = vshrl.u32 %v3441_v7, 16  ;;  %v447_v18 = vshll.u32 %v3441_v7, 16  ;;  %v317_v19 = vld [vmem:[%s3429_s12 + $0xc] sm:$0xf] }
  0x17   : > { %1270 = vrot.lane.b32.xlu1 %v3449_v10, %s3354_s19  ;;  %v3470_v20 = vld [vmem:[%s3429_s12 + $0x10] sm:$0xf]  ;;  %v396_v21 = vshrl.u32 %v317_v19, 16  ;;  %v399_v22 = vshll.u32 %v317_v19, 16  ;;  %v3473_v23 = vld [vmem:[%s3429_s12 + $0x14] sm:$0x1] }
  0x18   : > { %1272 = vrot.lane.b32.xlu0 %v3462_v16, %s3354_s19  ;;  %v409_v25 = vshrl.u32 %v3470_v20, 16  ;;  %v3485_v26 = vcombine.low %v317_v19, %v3470_v20  ;;  %v2822_v27 = vrot.slane %v317_v19, 9  ;;  %v815_v28 = vrot.slane %v3470_v20, 5  ;;  %v314_v29 = vld [vmem:[%s3429_s12] sm:$0xf]  ;;  %1880 = vmatpush1.bf16.msra.mxu0 %v3256_v8 }
  0x19   : > { %v818_v31 = vrot.slane %v3473_v23, 5  ;;  %v315_v32 = vld [vmem:[%s3429_s12 + $0x4] sm:$0xf]  ;;  %v316_v33 = vld [vmem:[%s3429_s12 + $0x8] sm:$0x1]  ;;  %v2821_v34 = vrot.slane %v314_v29, 9  ;;  %1881 = vmatprep.subr.bf16.mxu0 %v3257_v14 }
  0x1a   : > { %v816_v35 = vsel %vm3477_vm4, %v2822_v27, %v815_v28  ;;  %v817_v36 = vrot.slane %v815_v28, 4  ;;  %v808_v37 = vrot.slane %v315_v32, 5  ;;  %v811_v38 = vrot.slane %v316_v33, 5  ;;  %v3498_v39 = vld [vmem:[%s3429_s12 + $0x20] sm:$0x1] }
  0x1b   : > { %1197 = vrot.lane.b32.xlu1 %v3485_v26, %s3355_s26  ;;  %v2823_v40 = vrot.slane %v3435_v5, 9  ;;  %v822_v41 = vrot.slane %v3438_v6, 5  ;;  %v825_v42 = vrot.slane %v3498_v39, 5  ;;  %v372_v43 = vshrl.u32 %v314_v29, 16 }
  0x1c   : > { %v819_v44 = vsel %vm3477_vm4, %v817_v36, %v818_v31  ;;  %v809_v45 = vsel %vm3477_vm4, %v2821_v34, %v808_v37  ;;  %v810_v46 = vrot.slane %v808_v37, 4  ;;  %v375_v47 = vshll.u32 %v314_v29, 16  ;;  %1882 = vmatpush1.bf16.msra.mxu0 %v3259_v30  ;;  %v325_v34 = vld [vmem:[%s3429_s12 + $0x2c] sm:$0x1] }
  0x1d   : > { %v2872_v48 = vcombine.low %v816_v35, %v819_v44  ;;  %v823_v49 = vsel %vm3477_vm4, %v2823_v40, %v822_v41  ;;  %v824_v50 = vrot.slane %v822_v41, 4  ;;  %v374_v51 = vrot.slane %v372_v43, 4  ;;  %v3264_v43 = vld [vmem:[%s4955_s1 + $0x54] ss:$8 sps:$4 sm:$0xff]  }
  0x1e   : > { %v812_v52 = vsel %vm3477_vm4, %v810_v46, %v811_v38  ;;  %v377_v53 = vrot.slane %v375_v47, 5  ;;  %v381_v54 = vshll.u32 %v315_v32, 16  ;;  %v385_v55 = vshrl.u32 %v315_v32, 16 }
  0x1f   : > { %1235 = vrot.lane.b32.xlu0 %v2872_v48, %s3356_s27  ;;  %v2871_v56 = vcombine.low %v809_v45, %v812_v52  ;;  %v826_v57 = vsel %vm3477_vm4, %v824_v50, %v825_v42  ;;  %v391_v58 = vshll.u32 %v316_v33, 16  ;;  %v398_v59 = vrot.slane %v396_v21, 4 }
  0x20   : > { %v3516_v60 = vcombine.low %v823_v49, %v826_v57  ;;  %v378_v61 = vor.u32 %v377_v53, %v374_v51  ;;  %v383_v62 = vrot.slane %v381_v54, 5  ;;  %v387_v63 = vrot.slane %v385_v55, 4  ;;  %v3266_v49 = vld [vmem:[%s4955_s1 + $0x50] ss:$8 sps:$4 sm:$0xff]   ;;  %v3267_v54 = vld [vmem:[%s4955_s1 + $0x64] ss:$8 sps:$4 sm:$0xff]  }
  0x21   : > { %1162 = vrot.lane.b32.xlu1 %v2871_v56, %s3354_s19  ;;  %v393_v1 = vrot.slane %v391_v58, 5  ;;  %v401_v2 = vrot.slane %v399_v22, 5  ;;  %v405_v3 = vshll.u32 %v3470_v20, 16  ;;  %v411_v4 = vrot.slane %v409_v25, 4  ;;  %v3580_v57 = vld [vmem:[%s3429_s12 + $0x34] sm:$0xf] }
  0x22   : > { %v379_v8 = vrot.slane %v378_v61, 4  ;;  %v388_v14 = vor.u32 %v387_v63, %v383_v62  ;;  %v415_v19 = vshll.u32 %v3473_v23, 16  ;;  %v422_v21 = vrot.slane %v420_v11, 4 }
  0x23   : > { %1237 = vrot.lane.b32.xlu0 %v3516_v60, %s3356_s27  ;;  %v402_v27 = vor.u32 %v401_v2, %v398_v59  ;;  %v407_v28 = vrot.slane %v405_v3, 5  ;;  %v425_v29 = vrot.slane %v423_v12, 5  ;;  %v429_v22 = vshll.u32 %v3438_v6, 16  ;;  %v3260_v6 = vld [vmem:[%s4955_s1 + $0x44] ss:$8 sps:$4 sm:$0xff]  }
  0x24   : > { %v384_v20 = vsel %vm3521_vm5, %v379_v8, %v383_v62  ;;  %v389_v25 = vrot.slane %v388_v14, 4  ;;  %v417_v30 = vrot.slane %v415_v19, 5  ;;  %v435_v23 = vrot.slane %v433_v9, 4  ;;  %1883 = vmatprep.subr.bf16.mxu0 %v3260_v6  ;;  %v3591_v2 = vld [vmem:[%s3429_s12 + $0x38] sm:$0x1] }
  0x25   : > { %1164 = vrot.lane.b32.xlu1 %v2872_v48, %s3354_s19  ;;  %v403_v11 = vrot.slane %v402_v27, 4  ;;  %v412_v31 = vor.u32 %v411_v4, %v407_v28  ;;  %v426_v32 = vor.u32 %v425_v29, %v422_v21  ;;  %v431_v33 = vrot.slane %v429_v22, 5  ;;  %v3567_v48 = vld [vmem:[%s3429_s12 + $0x30] sm:$0xf]  ;;  %v3270_v19 = vld [vmem:[%s4955_s1 + $0x74] ss:$8 sps:$4 sm:$0xff]  }
  0x26   : > { %v394_v5 = vsel %vm3521_vm5, %v389_v25, %v393_v1  ;;  %v439_v12 = vshll.u32 %v3498_v39, 16  ;;  %v446_v35 = vrot.slane %v444_v17, 4  ;;  %v449_v36 = vrot.slane %v447_v18, 5  ;;  %v3262_v39 = vld [vmem:[%s4955_s1 + $0x40] ss:$8 sps:$4 sm:$0xff]  }
  0x27   : > { %v2855_v9 = vcombine.low %v384_v20, %v394_v5  ;;  %v408_v37 = vsel %vm3521_vm5, %v403_v11, %v407_v28  ;;  %v413_v38 = vrot.slane %v412_v31, 4  ;;  %v427_v40 = vrot.slane %v426_v32, 4  ;;  %1884 = vmatpush1.bf16.msra.mxu0 %v3262_v39  ;;  %v3274_v5 = vld [vmem:[%s4955_s1 + $0x84] ss:$8 sps:$4 sm:$0xff]  }
  0x28   : > { %v436_v41 = vor.u32 %v435_v23, %v431_v33  ;;  %v441_v17 = vrot.slane %v439_v12, 5  ;;  %v450_v42 = vor.u32 %v449_v36, %v446_v35  ;;  %v453_v18 = vshll.u32 %v3454_v13, 16  ;;  %1885 = vmatprep.subr.bf16.mxu0 %v3264_v43  ;;  %v3618_v23 = vld [vmem:[%s3429_s12 + $0x40] sm:$0xf] }
  0x29   : > { %1082 = vrot.lane.b32.xlu0 %v2855_v9, %s3356_s27  ;;  %v418_v44 = vsel %vm3521_vm5, %v413_v38, %v417_v30  ;;  %v432_v45 = vsel %vm3521_vm5, %v427_v40, %v431_v33  ;;  %v459_v46 = vrot.slane %v457_v15, 4  ;;  %v463_v47 = vshll.u32 %v325_v34, 16  ;;  %v3615_v30 = vld [vmem:[%s3429_s12 + $0x3c] sm:$0xf]  ;;  %v3272_v33 = vld [vmem:[%s4955_s1 + $0x70] ss:$8 sps:$4 sm:$0xff]  }
  0x2a   : > { %v3572_v50 = vcombine.low %v408_v37, %v418_v44  ;;  %v437_v51 = vrot.slane %v436_v41, 4  ;;  %v451_v52 = vrot.slane %v450_v42, 4  ;;  %v455_v53 = vrot.slane %v453_v18, 5  ;;  %v3276_v41 = vld [vmem:[%s4955_s1 + $0x80] ss:$8 sps:$4 sm:$0xff]  }
  0x2b   : > { %v2824_v15 = vrot.slane %v3441_v7, 9  ;;  %v829_v55 = vrot.slane %v3454_v13, 5  ;;  %v832_v56 = vrot.slane %v325_v34, 5  ;;  %v465_v61 = vrot.slane %v463_v47, 5  ;;  %1886 = vmatpush1.bf16.msra.mxu0 %v3266_v49  ;;  %v3269_v13 = vld [vmem:[%s4955_s1 + $0x60] ss:$8 sps:$4 sm:$0xff]  }
  0x2c   : > { %1084 = vrot.lane.b32.xlu1 %v3572_v50, %s3356_s27  ;;  %v442_v58 = vsel %vm3521_vm5, %v437_v51, %v441_v17  ;;  %v460_v59 = vor.u32 %v459_v46, %v455_v53  ;;  %v468_v62 = vshrl.u32 %v3567_v48, 16  ;;  %v471_v7 = vshll.u32 %v3567_v48, 16  ;;  %1887 = vmatprep.subr.bf16.mxu0 %v3267_v54  ;;  %v3277_v18 = vld [vmem:[%s4955_s1 + $0x94] ss:$8 sps:$4 sm:$0xff]   ;;  %v3280_v54 = vld [vmem:[%s4955_s1 + $0xa4] ss:$8 sps:$4 sm:$0xff]  }
  0x2d   : > { %v3587_v63 = vcombine.low %v432_v45, %v442_v58  ;;  %v831_v1 = vrot.slane %v829_v55, 4  ;;  %v456_v3 = vsel %vm3521_vm5, %v451_v52, %v455_v53  ;;  %v481_v8 = vshrl.u32 %v3580_v57, 16  ;;  %v331_v52 = vld [vmem:[%s3429_s12 + $0x44] sm:$0x1]  ;;  %v3279_v53 = vld [vmem:[%s4955_s1 + $0x90] ss:$8 sps:$4 sm:$0xff]  }
  0x2e   : > { %v461_v4 = vrot.slane %v460_v59, 4  ;;  %v470_v14 = vrot.slane %v468_v62, 4  ;;  %v830_v21 = vsel %vm3477_vm4, %v2824_v15, %v829_v55  ;;  %v473_v28 = vrot.slane %v471_v7, 5  ;;  %v3680_v62 = vld [vmem:[%s3429_s12 + $0x4c] sm:$0xf] }
  0x2f   : > { %1305 = vrot.lane.b32.xlu0 %v3587_v63, %s3355_s26  ;;  %v833_v27 = vsel %vm3477_vm4, %v831_v1, %v832_v56  ;;  %v477_v29 = vshll.u32 %v3580_v57, 16  ;;  %v483_v20 = vrot.slane %v481_v8, 4  ;;  %v487_v25 = vshll.u32 %v3591_v2, 16  ;;  %1888 = vmatpush1.bf16.msra.mxu0 %v3269_v13  ;;  %v3282_v1 = vld [vmem:[%s4955_s1 + $0xa0] ss:$8 sps:$4 sm:$0xff]  }
  0x30   : > { %1199 = vrot.lane.b32.xlu1 %v3449_v10, %s3355_s26  ;;  %v466_v22 = vsel %vm3521_vm5, %v461_v4, %v465_v61  ;;  %v474_v31 = vor.u32 %v473_v28, %v470_v14  ;;  %v3625_v34 = vcombine.low %v830_v21, %v833_v27  ;;  %1889 = vmatprep.subr.bf16.mxu0 %v3270_v19  ;;  %v836_v35 = vrot.slane %v3580_v57, 5  ;;  %v3677_v61 = vld [vmem:[%s3429_s12 + $0x48] sm:$0xf]  ;;  %v3286_v28 = vld [vmem:[%s4955_s1 + $0xb0] ss:$8 sps:$4 sm:$0xff]  }
  0x31   : > { %v3620_v11 = vcombine.low %v456_v3, %v466_v22  ;;  %v479_v32 = vrot.slane %v477_v29, 5  ;;  %v492_v36 = vshrl.u32 %v3615_v30, 16  ;;  %v495_v6 = vshll.u32 %v3615_v30, 16 }
  0x32   : > { %4971 = vst [vmem:[#allocation2_spill] sm:$0xff] %v3625_v34  ;;  %v475_v9 = vrot.slane %v474_v31, 4  ;;  %v489_v37 = vrot.slane %v487_v25, 5  ;;  %v505_v38 = vshrl.u32 %v3618_v23, 16  ;;  %v501_v39 = vshll.u32 %v3618_v23, 16 }
  0x33   : > { %1307 = vrot.lane.b32.xlu0 %v3620_v11, %s3355_s26  ;;  %v484_v12 = vor.u32 %v483_v20, %v479_v32  ;;  %1890 = vmatpush1.bf16.msra.mxu0 %v3272_v33  ;;  %v3644_v17 = vcombine.low %v3567_v48, %v3580_v57  ;;  %v2825_v42 = vrot.slane %v3567_v48, 9  ;;  %v838_v43 = vrot.slane %v836_v35, 4  ;;  %v3708_v20 = vld [vmem:[%s3429_s12 + $0x50] sm:$0x1]  ;;  %v3287_v25 = vld [vmem:[%s4955_s1 + $0xc4] ss:$8 sps:$4 sm:$0xff]  }
  0x34   : > { %1086 = vrot.lane.b32.xlu1 %v3587_v63, %s3356_s27  ;;  %1891 = vmatprep.subr.bf16.mxu0 %v3274_v5  ;;  %v839_v44 = vrot.slane %v3591_v2, 5  ;;  %v494_v45 = vrot.slane %v492_v36, 4  ;;  %v497_v46 = vrot.slane %v495_v6, 5  ;;  %v480_v47 = vsel %vm3521_vm5, %v475_v9, %v479_v32  ;;  %v3284_v2 = vld [vmem:[%s4955_s1 + $0xb4] ss:$8 sps:$4 sm:$0xff]  }
  0x35   : > { %v485_v40 = vrot.slane %v484_v12, 4  ;;  %v503_v49 = vrot.slane %v501_v39, 5  ;;  %v507_v51 = vrot.slane %v505_v38, 4  ;;  %v837_v55 = vsel %vm3477_vm4, %v2825_v42, %v836_v35  ;;  %v3289_v36 = vld [vmem:[%s4955_s1 + $0xc0] ss:$8 sps:$4 sm:$0xff]  }
  0x36   : > { %v840_v56 = vsel %vm3477_vm4, %v838_v43, %v839_v44  ;;  %v498_v57 = vor.u32 %v497_v46, %v494_v45  ;;  %v511_v59 = vshll.u32 %v331_v52, 16  ;;  %v843_v3 = vrot.slane %v3618_v23, 5  ;;  %v3290_v9 = vld [vmem:[%s4955_s1 + $0xd4] ss:$8 sps:$4 sm:$0xff]   ;;  %v3292_v43 = vld [vmem:[%s4955_s1 + $0xd0] ss:$8 sps:$4 sm:$0xff]  }
  0x37   : > { %1239 = vrot.lane.b32.xlu0 %v3625_v34, %s3356_s27  ;;  %v490_v48 = vsel %vm3521_vm5, %v485_v40, %v489_v37  ;;  %1892 = vmatpush1.bf16.msra.mxu0 %v3276_v41  ;;  %v508_v58 = vor.u32 %v507_v51, %v503_v49  ;;  %v3685_v7 = vcombine.low %v837_v55, %v840_v56  ;;  %v516_v4 = vshrl.u32 %v3677_v61, 16  ;;  %v3739_v42 = vld [vmem:[%s3429_s12 + $0x54] sm:$0xf]  ;;  %v3296_v55 = vld [vmem:[%s4955_s1 + $0xe0] ss:$8 sps:$4 sm:$0xff]  }
  0x38   : > { %1166 = vrot.lane.b32.xlu1 %v3516_v60, %s3354_s19  ;;  %1893 = vmatprep.subr.bf16.mxu0 %v3277_v18  ;;  %v3668_v15 = vcombine.low %v480_v47, %v490_v48  ;;  %v499_v13 = vrot.slane %v498_v57, 4  ;;  %v519_v8 = vshll.u32 %v3677_v61, 16  ;;  %v513_v19 = vrot.slane %v511_v59, 5  ;;  %v3742_v18 = vld [vmem:[%s3429_s12 + $0x58] sm:$0xf] }
  0x39   : > { %4972 = vst [vmem:[#allocation3_spill] sm:$0xff] %v3685_v7  ;;  %v509_v14 = vrot.slane %v508_v58, 4  ;;  %v529_v21 = vshrl.u32 %v3680_v62, 16  ;;  %v525_v27 = vshll.u32 %v3680_v62, 16  ;;  %v3704_v29 = vcombine.low %v3615_v30, %v3618_v23  ;;  %v3294_v47 = vld [vmem:[%s4955_s1 + $0xe4] ss:$8 sps:$4 sm:$0xff]  }
  0x3a   : > { %v2826_v22 = vrot.slane %v3615_v30, 9  ;;  %v845_v31 = vrot.slane %v843_v3, 4  ;;  %v846_v32 = vrot.slane %v331_v52, 5  ;;  %v518_v33 = vrot.slane %v516_v4, 4  ;;  %v3298_v58 = vld [vmem:[%s4955_s1 + $0xf4] ss:$8 sps:$4 sm:$0xff]  }
  0x3b   : > { %1274 = vrot.lane.b32.xlu0 %v3644_v17, %s3354_s19  ;;  %1894 = vmatpush1.bf16.msra.mxu0 %v3279_v53  ;;  %v521_v5 = vrot.slane %v519_v8, 5  ;;  %v504_v30 = vsel %vm3521_vm5, %v499_v13, %v503_v49  ;;  %v514_v23 = vsel %vm3521_vm5, %v509_v14, %v513_v19  ;;  %v527_v12 = vrot.slane %v525_v27, 5  ;;  %v3305_v14 = vld [vmem:[%s4955_s1 + $0x104] ss:$8 sps:$4 sm:$0xff]   ;;  %v3300_v19 = vld [vmem:[%s4955_s1 + $0xf0] ss:$8 sps:$4 sm:$0xff]  }
  0x3c   : > { %1201 = vrot.lane.b32.xlu1 %v3462_v16, %s3355_s26  ;;  %1895 = vmatprep.subr.bf16.mxu0 %v3280_v54  ;;  %v531_v35 = vrot.slane %v529_v21, 4  ;;  %v535_v6 = vshll.u32 %v3708_v20, 16  ;;  %v3730_v37 = vcombine.low %v504_v30, %v514_v23  ;;  %v844_v38 = vsel %vm3477_vm4, %v2826_v22, %v843_v3  ;;  %v3791_v21 = vld [vmem:[%s4955_s1 + $0x100] ss:$8 sps:$4 sm:$0xff]   ;;  %v3818_v30 = vld [vmem:[%s4955_s1 + $0x110] ss:$8 sps:$4 sm:$0xff]  }
  0x3d   : > { %v847_v40 = vsel %vm3477_vm4, %v845_v31, %v846_v32  ;;  %v522_v39 = vor.u32 %v521_v5, %v518_v33  ;;  %v850_v46 = vrot.slane %v3680_v62, 5  ;;  %v540_v49 = vshrl.u32 %v3739_v42, 16  ;;  %3078 = vmatprep.subr.bf16.mxu1 %v3305_v14  ;;  %v3808_v33 = vld [vmem:[%s3429_s12 + $0x64] sm:$0xf]  ;;  %v3813_v5 = vld [vmem:[%s4955_s1 + $0x114] ss:$8 sps:$4 sm:$0xff]  }
  0x3e   : > { %v532_v41 = vor.u32 %v531_v35, %v527_v12  ;;  %v3747_v44 = vcombine.low %v844_v38, %v847_v40  ;;  %v537_v45 = vrot.slane %v535_v6, 5  ;;  %v543_v51 = vshll.u32 %v3739_v42, 16  ;;  %3080 = vmatpush1.bf16.msra.mxu1 %v3791_v21 }
  0x3f   : > { %1309 = vrot.lane.b32.xlu0 %v3668_v15, %s3355_s26  ;;  %1896 = vmatpush1.bf16.msra.mxu0 %v3282_v1  ;;  %v523_v48 = vrot.slane %v522_v39, 4  ;;  %v553_v52 = vshrl.u32 %v3742_v18, 16  ;;  %v549_v54 = vshll.u32 %v3742_v18, 16  ;;  %v3766_v56 = vcombine.low %v3677_v61, %v3680_v62 }
  0x40   : > { %1088 = vrot.lane.b32.xlu1 %v3620_v11, %s3356_s27  ;;  %1897 = vmatprep.subr.bf16.mxu0 %v3284_v2  ;;  %4973 = vst [vmem:[#allocation4_spill] sm:$0xff] %v3747_v44  ;;  %v533_v53 = vrot.slane %v532_v41, 4  ;;  %v2827_v57 = vrot.slane %v3677_v61, 9  ;;  %v852_v59 = vrot.slane %v850_v46, 4  ;;  %v853_v1 = vrot.slane %v3708_v20, 5 }
  0x41   : > { %v337_v2 = vld [vmem:[%s3429_s12 + $0x5c] sm:$0x1]  ;;  %v542_v13 = vrot.slane %v540_v49, 4  ;;  %v545_v3 = vrot.slane %v543_v51, 5  ;;  %v528_v61 = vsel %vm3521_vm5, %v523_v48, %v527_v12  ;;  %v551_v4 = vrot.slane %v549_v54, 5  ;;  %3079 = vmatprep.subr.bf16.mxu1 %v3813_v5 }
  0x42   : > { %v538_v62 = vsel %vm3521_vm5, %v533_v53, %v537_v45  ;;  %v555_v8 = vrot.slane %v553_v52, 4  ;;  %v559_v27 = vshll.u32 %v337_v2, 16  ;;  %v3798_v20 = vld [vmem:[%s3429_s12 + $0x60] sm:$0xf]  ;;  %v854_v31 = vsel %vm3477_vm4, %v852_v59, %v853_v1  ;;  %3081 = vmatpush1.bf16.msra.mxu1 %v3818_v30  ;;  %v340_v54 = vld [vmem:[%s3429_s12 + $0x68] sm:$0x1] }
  0x43   : > { %1241 = vrot.lane.b32.xlu0 %v3685_v7, %s3356_s27  ;;  %1898 = vmatpush1.bf16.msra.mxu0 %v3286_v28  ;;  %v3795_v28 = vcombine.low %v528_v61, %v538_v62  ;;  %v546_v22 = vor.u32 %v545_v3, %v542_v13  ;;  %v857_v12 = vrot.slane %v3742_v18, 5  ;;  %v564_v35 = vshrl.u32 %v3798_v20, 16 }
  0x44   : > { %1168 = vrot.lane.b32.xlu1 %v3625_v34, %s3354_s19  ;;  %1899 = vmatprep.subr.bf16.mxu0 %v3287_v25  ;;  %v851_v25 = vsel %vm3477_vm4, %v2827_v57, %v850_v46  ;;  %v556_v32 = vor.u32 %v555_v8, %v551_v4  ;;  %v561_v23 = vrot.slane %v559_v27, 5  ;;  %v577_v38 = vshrl.u32 %v3808_v33, 16 }
  0x45   : > { %v3826_v6 = vcombine.low %v851_v25, %v854_v31  ;;  %v573_v39 = vshll.u32 %v3808_v33, 16  ;;  %v2828_v41 = vrot.slane %v3739_v42, 9  ;;  %v860_v45 = vrot.slane %v337_v2, 5  ;;  %v3861_v2 = vld [vmem:[%s3429_s12 + $0x70] sm:$0xf] }
  0x46   : > { %v557_v40 = vrot.slane %v556_v32, 4  ;;  %v3838_v46 = vcombine.low %v3739_v42, %v3742_v18  ;;  %v579_v53 = vrot.slane %v577_v38, 4  ;;  %v583_v1 = vshll.u32 %v340_v54, 16 }
  0x47   : > { %1276 = vrot.lane.b32.xlu0 %v3704_v29, %s3354_s19  ;;  %1900 = vmatpush1.bf16.msra.mxu0 %v3289_v36  ;;  %v567_v36 = vshll.u32 %v3798_v20, 16  ;;  %4974 = vst [vmem:[#allocation5_spill] sm:$0xff] %v3826_v6  ;;  %v575_v52 = vrot.slane %v573_v39, 5  ;;  %v858_v18 = vsel %vm3477_vm4, %v2828_v41, %v857_v12  ;;  %v864_v61 = vrot.slane %v3808_v33, 5 }
  0x48   : > { %1203 = vrot.lane.b32.xlu1 %v3644_v17, %s3355_s26  ;;  %1901 = vmatprep.subr.bf16.mxu0 %v3290_v9  ;;  %v547_v9 = vrot.slane %v546_v22, 4  ;;  %v562_v51 = vsel %vm3521_vm5, %v557_v40, %v561_v23  ;;  %v597_v27 = vshll.u32 %v3861_v2, 16  ;;  %v3876_v22 = vcombine.low %v3798_v20, %v3808_v33 }
  0x49   : > { %v569_v48 = vrot.slane %v567_v36, 5  ;;  %v580_v59 = vor.u32 %v579_v53, %v575_v52  ;;  %v2829_v25 = vrot.slane %v3798_v20, 9  ;;  %v866_v31 = vrot.slane %v864_v61, 4  ;;  %v343_v36 = vld [vmem:[%s3429_s12 + $0x74] sm:$0x1] }
  0x4a   : > { %v552_v49 = vsel %vm3521_vm5, %v547_v9, %v551_v4  ;;  %v867_v32 = vrot.slane %v340_v54, 5  ;;  %v599_v20 = vrot.slane %v597_v27, 5  ;;  %v871_v53 = vrot.slane %v3861_v2, 5 }
  0x4b   : > { %1311 = vrot.lane.b32.xlu0 %v3730_v37, %s3355_s26  ;;  %1902 = vmatpush1.bf16.msra.mxu0 %v3292_v43  ;;  %v859_v43 = vrot.slane %v857_v12, 4  ;;  %v3849_v42 = vcombine.low %v552_v49, %v562_v51  ;;  %v581_v8 = vrot.slane %v580_v59, 4  ;;  %v865_v38 = vsel %vm3477_vm4, %v2829_v25, %v864_v61 }
  0x4c   : > { %1090 = vrot.lane.b32.xlu1 %v3668_v15, %s3356_s27  ;;  %1903 = vmatprep.subr.bf16.mxu0 %v3294_v47  ;;  %v566_v47 = vrot.slane %v564_v35, 4  ;;  %v868_v39 = vsel %vm3477_vm4, %v866_v31, %v867_v32 }
  0x4d   : > { %v3900_v49 = vcombine.low %v865_v38, %v868_v39 }
  0x4e   : > { %v570_v57 = vor.u32 %v569_v48, %v566_v47  ;;  %v344_v47 = vld [vmem:[%s3429_s12 + $0x78] sm:$0xf]  ;;  %v345_v48 = vld [vmem:[%s3429_s12 + $0x7c] sm:$0xf] }
  0x4f   : > { %1243 = vrot.lane.b32.xlu0 %v3747_v44, %s3356_s27  ;;  %1904 = vmatpush1.bf16.msra.mxu0 %v3296_v55  ;;  %v861_v55 = vsel %vm3477_vm4, %v859_v43, %v860_v45  ;;  %v607_v43 = vshll.u32 %v343_v36, 16  ;;  %v612_v54 = vshrl.u32 %v344_v47, 16  ;;  %v621_v59 = vshll.u32 %v345_v48, 16 }
  0x50   : > { %1170 = vrot.lane.b32.xlu1 %v3685_v7, %s3354_s19  ;;  %1905 = vmatprep.subr.bf16.mxu0 %v3298_v58  ;;  %v3856_v58 = vld [vmem:[%s3429_s12 + $0x6c] sm:$0xf]  ;;  %v3863_v13 = vcombine.low %v858_v18, %v861_v55  ;;  %v571_v3 = vrot.slane %v570_v57, 4  ;;  %v615_v55 = vshll.u32 %v344_v47, 16  ;;  %v625_v57 = vshrl.u32 %v345_v48, 16 }
  0x51   : > { %v588_v62 = vshrl.u32 %v3856_v58, 16  ;;  %v591_v4 = vshll.u32 %v3856_v58, 16  ;;  %v878_v38 = vrot.slane %v345_v48, 5 }
  0x52   : > { %v576_v35 = vsel %vm3521_vm5, %v571_v3, %v575_v52  ;;  %v609_v52 = vrot.slane %v607_v43, 5  ;;  %v2830_v3 = vrot.slane %v3856_v58, 9  ;;  %v627_v27 = vrot.slane %v625_v57, 4 }
  0x53   : > { %1278 = vrot.lane.b32.xlu0 %v3766_v56, %s3354_s19  ;;  %1906 = vmatpush1.bf16.msra.mxu0 %v3300_v19  ;;  %v601_v19 = vshrl.u32 %v3861_v2, 16  ;;  %v590_v23 = vrot.slane %v588_v62, 4  ;;  %v593_v12 = vrot.slane %v591_v4, 5  ;;  %v873_v62 = vrot.slane %v871_v53, 4 }
  0x54   : > { %1205 = vrot.lane.b32.xlu1 %v3704_v29, %s3355_s26  ;;  %2068 = vmatprep.subr.bf16.mxu0 %v3305_v14  ;;  %v585_v14 = vrot.slane %v583_v1, 5  ;;  %v3909_v1 = vcombine.low %v3856_v58, %v3861_v2  ;;  %v874_v4 = vrot.slane %v343_v36, 5  ;;  %v623_v58 = vrot.slane %v621_v59, 5  ;;  %v3935_v36 = vld [vmem:[%s3429_s12 + $0x88] sm:$0xf] }
  0x55   : > { %v603_v9 = vrot.slane %v601_v19, 4  ;;  %v594_v41 = vor.u32 %v593_v12, %v590_v23  ;;  %v617_v19 = vrot.slane %v615_v55, 5  ;;  %v872_v31 = vsel %vm3477_vm4, %v2830_v3, %v871_v53 }
  0x56   : > { %v586_v33 = vsel %vm3521_vm5, %v581_v8, %v585_v14  ;;  %v614_v8 = vrot.slane %v612_v54, 4  ;;  %v346_v14 = vld [vmem:[%s3429_s12 + $0x80] sm:$0x1]  ;;  %v875_v32 = vsel %vm3477_vm4, %v873_v62, %v874_v4  ;;  %v3947_v53 = vcombine.low %v344_v47, %v345_v48  ;;  %v349_v48 = vld [vmem:[%s3429_s12 + $0x8c] sm:$0x1] }
  0x57   : > { %1313 = vrot.lane.b32.xlu0 %v3795_v28, %s3355_s26  ;;  %v3892_v40 = vcombine.low %v576_v35, %v586_v33  ;;  %v604_v45 = vor.u32 %v603_v9, %v599_v20  ;;  %v595_v51 = vrot.slane %v594_v41, 4  ;;  %v631_v23 = vshll.u32 %v346_v14, 16  ;;  %v3932_v33 = vld [vmem:[%s3429_s12 + $0x84] sm:$0xf] }
  0x58   : > { %1092 = vrot.lane.b32.xlu1 %v3730_v37, %s3356_s27  ;;  %v618_v12 = vor.u32 %v617_v19, %v614_v8  ;;  %v628_v35 = vor.u32 %v627_v27, %v623_v58  ;;  %v636_v39 = vshrl.u32 %v3932_v33, 16  ;;  %v639_v41 = vshll.u32 %v3932_v33, 16 }
  0x59   : > { %v605_v18 = vrot.slane %v604_v45, 4  ;;  %v600_v61 = vsel %vm3521_vm5, %v595_v51, %v599_v20  ;;  %v3937_v20 = vcombine.low %v872_v31, %v875_v32  ;;  %v633_v9 = vrot.slane %v631_v23, 5  ;;  %v3972_v31 = vld [vmem:[%s3429_s12 + $0x90] sm:$0xf]  ;;  %v3976_v32 = vld [vmem:[%s3429_s12 + $0x94] sm:$0xf] }
  0x5a   : > { %v619_v43 = vrot.slane %v618_v12, 4  ;;  %v629_v45 = vrot.slane %v628_v35, 4  ;;  %v649_v51 = vshrl.u32 %v3935_v36, 16  ;;  %v2831_v54 = vrot.slane %v344_v47, 9 }
  0x5b   : > { %1245 = vrot.lane.b32.xlu0 %v3826_v6, %s3356_s27  ;;  %v610_v2 = vsel %vm3521_vm5, %v605_v18, %v609_v52  ;;  %v645_v52 = vshll.u32 %v3935_v36, 16  ;;  %v880_v18 = vrot.slane %v878_v38, 4  ;;  %v881_v55 = vrot.slane %v346_v14, 5 }
  0x5c   : > { %1172 = vrot.lane.b32.xlu1 %v3747_v44, %s3354_s19  ;;  %v3923_v25 = vcombine.low %v600_v61, %v610_v2  ;;  %v638_v57 = vrot.slane %v636_v39, 4  ;;  %v641_v59 = vrot.slane %v639_v41, 5  ;;  %v624_v3 = vsel %vm3521_vm5, %v619_v43, %v623_v58 }
  0x5d   : > { %v634_v61 = vsel %vm3521_vm5, %v629_v45, %v633_v9  ;;  %v647_v62 = vrot.slane %v645_v52, 5  ;;  %v651_v47 = vrot.slane %v649_v51, 4  ;;  %v879_v4 = vsel %vm3477_vm4, %v2831_v54, %v878_v38 }
  0x5e   : > { %v4961_v8 = vmov 0   ;;  %v3963_v2 = vcombine.low %v624_v3, %v634_v61  ;;  %v882_v14 = vsel %vm3477_vm4, %v880_v18, %v881_v55  ;;  %v642_v19 = vor.u32 %v641_v59, %v638_v57 }
  0x5f   : > { %1280 = vrot.lane.b32.xlu0 %v3838_v46, %s3354_s19  ;;  %2150 = vmatprep.mubr.bf16.mxu1 %v4961_v8  ;;  %v655_v58 = vshll.u32 %v349_v48, 16  ;;  %v652_v27 = vor.u32 %v651_v47, %v647_v62  ;;  %v3978_v23 = vcombine.low %v879_v4, %v882_v14  ;;  %v885_v9 = vrot.slane %v3935_v36, 5 }
  0x60   : > { %1207 = vrot.lane.b32.xlu1 %v3766_v56, %s3355_s26  ;;  %2934 = vmatmul.mubr.msk.bf16.vlgmr.msra.gmra.mrb[0].mxu1 %vm1340_vm6, %v3863_v13  ;;  %v643_v12 = vrot.slane %v642_v19, 4  ;;  %v663_v39 = vshll.u32 %v3972_v31, 16  ;;  %v673_v41 = vshrl.u32 %v3976_v32, 16  ;;  %v669_v43 = vshll.u32 %v3976_v32, 16 }
  0x61   : > { %2160 = vmatprep.mubr.bf16.mxu1 %v4961_v8  ;;  %v657_v35 = vrot.slane %v655_v58, 5  ;;  %v653_v38 = vrot.slane %v652_v27, 4  ;;  %v3993_v51 = vcombine.low %v3932_v33, %v3935_v36  ;;  %v2832_v52 = vrot.slane %v3932_v33, 9  ;;  %v352_v36 = vld [vmem:[%s3429_s12 + $0x98] sm:$0x1] }
  0x62   : > { %v648_v18 = vsel %vm3521_vm5, %v643_v12, %v647_v62  ;;  %v887_v55 = vrot.slane %v885_v9, 4  ;;  %v888_v57 = vrot.slane %v349_v48, 5  ;;  %v665_v3 = vrot.slane %v663_v39, 5  ;;  %v4023_v27 = vld [vmem:[%s3429_s12 + $0x9c] sm:$0xf] }
  0x63   : > { %1315 = vrot.lane.b32.xlu0 %v3849_v42, %s3355_s26  ;;  %v658_v33 = vsel %vm3521_vm5, %v653_v38, %v657_v35  ;;  %v671_v61 = vrot.slane %v669_v43, 5  ;;  %v675_v47 = vrot.slane %v673_v41, 4  ;;  %v886_v48 = vsel %vm3477_vm4, %v2832_v52, %v885_v9  ;;  %v4026_v35 = vld [vmem:[%s3429_s12 + $0xa0] sm:$0xf] }
  0x64   : > { %1094 = vrot.lane.b32.xlu1 %v3795_v28, %s3356_s27  ;;  %v889_v4 = vsel %vm3477_vm4, %v887_v55, %v888_v57  ;;  %v679_v14 = vshll.u32 %v352_v36, 16  ;;  %v892_v39 = vrot.slane %v3976_v32, 5  ;;  %v684_v41 = vshrl.u32 %v4023_v27, 16 }
  0x65   : > { %v676_v58 = vor.u32 %v675_v47, %v671_v61  ;;  %v687_v43 = vshll.u32 %v4023_v27, 16  ;;  %v697_v55 = vshrl.u32 %v4026_v35, 16  ;;  %v693_v57 = vshll.u32 %v4026_v35, 16 }
  0x66   : > { %v681_v38 = vrot.slane %v679_v14, 5  ;;  %v895_v47 = vrot.slane %v352_v36, 5  ;;  %v3328_v36 = vld [vmem:[%s3429_s12] sm:$0xf] }
  0x67   : > { %1247 = vrot.lane.b32.xlu0 %v3863_v13, %s3356_s27 }
  0x68   : > { %1174 = vrot.lane.b32.xlu1 %v3826_v6, %s3354_s19  ;;  %2935 = vmatmul.mubr.msk.bf16.gmra.mrb[4].mxu1 %vm1340_vm6, %v3900_v49 }
  0x69   : > { %2170 = vmatprep.mubr.bf16.mxu1 %v4961_v8 }
  0x6b   : > { %1282 = vrot.lane.b32.xlu0 %v3876_v22, %s3354_s19 }
  0x6c   : > { %1209 = vrot.lane.b32.xlu1 %v3838_v46, %s3355_s26 }
  0x6f   : > { %1317 = vrot.lane.b32.xlu0 %v3892_v40, %s3355_s26 }
  0x70   : > { %1096 = vrot.lane.b32.xlu1 %v3849_v42, %s3356_s27  ;;  %2936 = vmatmul.mubr.msk.bf16.gmra.mrb[8].mxu1 %vm1340_vm6, %v3937_v20 }
  0x71   : > { %2180 = vmatprep.mubr.bf16.mxu1 %v4961_v8  ;;  %v699_v8 = vrot.slane %v697_v55, 4  ;;  %v4079_v55 = vld [vmem:[%s3429_s12 + $0xa8] sm:$0xf] }
  0x73   : > { %1249 = vrot.lane.b32.xlu0 %v3900_v49, %s3356_s27 }
  0x74   : > { %1176 = vrot.lane.b32.xlu1 %v3863_v13, %s3354_s19  ;;  %v660_v13 = vshrl.u32 %v3972_v31, 16 }
  0x76   : > { %v662_v59 = vrot.slane %v660_v13, 4  ;;  %v4028_v13 = vcombine.low %v886_v48, %v889_v4  ;;  %v686_v48 = vrot.slane %v684_v41, 4  ;;  %v689_v4 = vrot.slane %v687_v43, 5  ;;  %v3329_v41 = vld [vmem:[%s3429_s12 + $0x4] sm:$0xf] }
  0x77   : > { %1284 = vrot.lane.b32.xlu0 %v3909_v1, %s3354_s19  ;;  %v2839_v43 = vcombine.low %v3328_v36, %v3329_v41  ;;  %v708_v36 = vshrl.u32 %v4079_v55, 16  ;;  %v711_v41 = vshll.u32 %v4079_v55, 16 }
  0x78   : > { %1211 = vrot.lane.b32.xlu1 %v3876_v22, %s3355_s26  ;;  %v666_v19 = vor.u32 %v665_v3, %v662_v59  ;;  %v894_v3 = vrot.slane %v892_v39, 4  ;;  %2937 = vmatmul.mubr.msk.bf16.gmra.mrb[12].mxu1 %vm1340_vm6, %v3978_v23 }
  0x7a   : > { %v667_v52 = vrot.slane %v666_v19, 4 }
  0x7b   : > { %1319 = vrot.lane.b32.xlu0 %v3923_v25, %s3355_s26 }
  0x7c   : > { %1098 = vrot.lane.b32.xlu1 %v3892_v40, %s3356_s27  ;;  %v672_v19 = vsel %vm3521_vm5, %v667_v52, %v671_v61 }
  0x7f   : > { %1251 = vrot.lane.b32.xlu0 %v3937_v20, %s3356_s27 }
  0x80   : > { %1178 = vrot.lane.b32.xlu1 %v3900_v49, %s3354_s19  ;;  %v4014_v49 = vcombine.low %v648_v18, %v658_v33  ;;  %v677_v18 = vrot.slane %v676_v58, 4  ;;  %v4044_v33 = vcombine.low %v3972_v31, %v3976_v32  ;;  %v4058_v58 = vld [vmem:[%s3429_s12 + $0xa4] sm:$0x1] }
  0x82   : > { %v682_v32 = vsel %vm3521_vm5, %v677_v18, %v681_v38  ;;  %v896_v38 = vsel %vm3477_vm4, %v894_v3, %v895_v47  ;;  %v690_v18 = vor.u32 %v689_v4, %v686_v48 }
  0x83   : > { %1286 = vrot.lane.b32.xlu0 %v3947_v53, %s3354_s19  ;;  %v4068_v52 = vcombine.low %v672_v19, %v682_v32  ;;  %v4084_v32 = vld [vmem:[%s3429_s12 + $0xac] sm:$0xf] }
  0x84   : > { %1213 = vrot.lane.b32.xlu1 %v3909_v1, %s3355_s26 }
  0x87   : > { %1321 = vrot.lane.b32.xlu0 %v3963_v2, %s3355_s26 }
  0x88   : > { %1100 = vrot.lane.b32.xlu1 %v3923_v25, %s3356_s27 }
  0x89   : > { %v3989_v45 = vpop.permute.xlu1 %1270 }
  0x8a   : > { %v3998_v54 = vpop.permute.xlu0 %1272 }
  0x8b   : > { %1253 = vrot.lane.b32.xlu0 %v3978_v23, %s3356_s27 }
  0x8c   : > { %1180 = vrot.lane.b32.xlu1 %v3937_v20, %s3354_s19  ;;  %v2833_v20 = vrot.slane %v3972_v31, 9  ;;  %v4060_v31 = vrot.slane %v693_v57, 5  ;;  %v703_v57 = vshll.u32 %v4058_v58, 16 }
  0x8d   : > { %v4010_v62 = vpop.permute.xlu1 %1197 }
  0x8e   : > { %v893_v6 = vsel %vm3477_vm4, %v2833_v20, %v892_v39  ;;  %v700_v39 = vor.u32 %v699_v8, %v4060_v31  ;;  %v4975_v20 = vmov 0   ;;  %v691_v8 = vrot.slane %v690_v18, 4 }
  0x8f   : > { %1288 = vrot.lane.b32.xlu0 %v3993_v51, %s3354_s19  ;;  %2190 = vmatprep.mubr.bf16.mxu1 %v4975_v20  ;;  %v4088_v48 = vcombine.low %v893_v6, %v896_v38  ;;  %v705_v4 = vrot.slane %v703_v57, 5  ;;  %v721_v6 = vshrl.u32 %v4084_v32, 16  ;;  %v2834_v18 = vrot.slane %v4023_v27, 9 }
  0x90   : > { %1215 = vrot.lane.b32.xlu1 %v3947_v53, %s3355_s26  ;;  %2938 = vmatmul.mubr.msk.bf16.gmra.mrb[16].mxu1 %vm1340_vm6, %v4028_v13 }
  0x91   : > { %v1236_v12 = vpop.permute.xlu0 %1235  ;;  %2200 = vmatprep.mubr.bf16.mxu1 %v4975_v20 }
  0x92   : > { %v1473_v3 = vsel %vm1340_vm6, %v3572_v50, %v1236_v12  ;;  %v701_v12 = vrot.slane %v700_v39, 4 }
  0x93   : > { %1323 = vrot.lane.b32.xlu0 %v4014_v49, %s3355_s26  ;;  %v1163_v9 = vpop.permute.xlu1 %1162  ;;  %v1520_v38 = vsel %vm1389_vm7, %v1473_v3, %v3989_v45  ;;  %v4113_v45 = vcombine.low %v4023_v27, %v4026_v35 }
  0x94   : > { %1102 = vrot.lane.b32.xlu1 %v3963_v2, %s3356_s27 }
  0x95   : > { %v1238_v59 = vpop.permute.xlu0 %1237 }
  0x96   : > { %v1476_v57 = vsel %vm1340_vm6, %v3587_v63, %v1238_v59  ;;  %v713_v63 = vrot.slane %v711_v41, 5  ;;  %v696_v59 = vsel %vm3521_vm5, %v691_v8, %v4060_v31  ;;  %v4150_v41 = vld [vmem:[%s3429_s12 + $0xb4] sm:$0xf] }
  0x97   : > { %1255 = vrot.lane.b32.xlu0 %v4028_v13, %s3356_s27  ;;  %v4051_v14 = vpop.permute.xlu1 %1164  ;;  %v1522_v27 = vsel %vm1389_vm7, %v1476_v57, %v3998_v54 }
  0x98   : > { %1182 = vrot.lane.b32.xlu1 %v3978_v23, %s3354_s19  ;;  %v899_v23 = vrot.slane %v4026_v35, 5  ;;  %v4127_v35 = vld [vmem:[%s3429_s12 + $0xb0] sm:$0x1]  ;;  %2939 = vmatmul.mubr.msk.bf16.gmra.mrb[20].mxu1 %vm1340_vm6, %v4088_v48 }
  0x99   : > { %2210 = vmatprep.mubr.bf16.mxu1 %v4975_v20 }
  0x9a   : > { %v901_v34 = vrot.slane %v899_v23, 4 }
  0x9b   : > { %1290 = vrot.lane.b32.xlu0 %v4044_v33, %s3354_s19  ;;  %v1083_v61 = vpop.permute.xlu0 %1082 }
  0x9c   : > { %1217 = vrot.lane.b32.xlu1 %v3993_v51, %s3355_s26  ;;  %v1343_v19 = vsel %vm1340_vm6, %v2839_v43, %v1083_v61  ;;  %v717_v43 = vshll.u32 %v4084_v32, 16 }
  0x9d   : > { %v1391_v50 = vsel %vm1389_vm7, %v1343_v19, %v1163_v9  ;;  %v902_v9 = vrot.slane %v4058_v58, 5  ;;  %v710_v19 = vrot.slane %v708_v36, 4 }
  0x9e   : > { %v1085_v47 = vpop.permute.xlu1 %1084  ;;  %v1424_v39 = vsel %vm1422_vm8, %v1391_v50, %v4010_v62  ;;  %v4122_v58 = vrot.slane %v717_v43, 5  ;;  %v723_v62 = vrot.slane %v721_v6, 4  ;;  %v4153_v50 = vld [vmem:[%s3429_s12 + $0xb8] sm:$0xf]  ;;  %v906_v6 = vrot.slane %v4084_v32, 5 }
  0x9f   : > { %1325 = vrot.lane.b32.xlu0 %v4068_v52, %s3355_s26  ;;  %v903_v36 = vsel %vm3477_vm4, %v901_v34, %v902_v9  ;;  %v727_v34 = vshll.u32 %v4127_v35, 16  ;;  %v745_v57 = vshrl.u32 %v4153_v50, 16  ;;  %v741_v9 = vshll.u32 %v4153_v50, 16 }
  0xa0   : > { %1104 = vrot.lane.b32.xlu1 %v4014_v49, %s3356_s27 }
  0xa1   : > { %v1306_v61 = vpop.permute.xlu0 %1305 }
  0xa2   : > { %v1552_v44 = vsel %vm1422_vm8, %v1520_v38, %v1306_v61  ;;  %v1200_v7 = vpop.permute.xlu1 %1199  ;;  %v732_v38 = vshrl.u32 %v4150_v41, 16 }
  0xa3   : > { %1257 = vrot.lane.b32.xlu0 %v4088_v48, %s3356_s27  ;;  %1907 = vmatprep.mubr.bf16.mxu0 %v1552_v44  ;;  %v706_v44 = vsel %vm3521_vm5, %v701_v12, %v705_v4  ;;  %v900_v4 = vsel %vm3477_vm4, %v2834_v18, %v899_v23  ;;  %v724_v23 = vor.u32 %v723_v62, %v4122_v58  ;;  %v735_v18 = vshll.u32 %v4150_v41, 16 }
  0xa4   : > { %1908 = vmatmul.mubr.bf16.vlgmr.msra.gmra.mrb[0].mxu0 %v1424_v39  ;;  %1184 = vrot.lane.b32.xlu1 %v4028_v13, %s3354_s19  ;;  %v4143_v54 = vcombine.low %v696_v59, %v706_v44  ;;  %v714_v13 = vor.u32 %v713_v63, %v710_v19  ;;  %v4158_v12 = vcombine.low %v900_v4, %v903_v36  ;;  %v2835_v63 = vrot.slane %v4079_v55, 9  ;;  %v361_v36 = vld [vmem:[%s3429_s12 + $0xbc] sm:$0x1] }
  0xa5   : > { %v1308_v3 = vpop.permute.xlu0 %1307  ;;  %2069 = vmatpush1.bf16.msra.mxu0 %v3791_v21  ;;  %v1346_v21 = vsel %vm1340_vm6, %v3485_v26, %v1085_v47  ;;  %v4174_v19 = vcombine.low %v4079_v55, %v4084_v32  ;;  %v908_v59 = vrot.slane %v906_v6, 4  ;;  %v909_v44 = vrot.slane %v4127_v35, 5 }
  0xa6   : > { %v1555_v31 = vsel %vm1422_vm8, %v1522_v27, %v1308_v3  ;;  %v1087_v8 = vpop.permute.xlu1 %1086  ;;  %2070 = vmatprep.subr.bf16.mxu0 %v3813_v5  ;;  %v1393_v47 = vsel %vm1389_vm7, %v1346_v21, %v4051_v14  ;;  %v715_v61 = vrot.slane %v714_v13, 4  ;;  %v729_v14 = vrot.slane %v727_v34, 5  ;;  %v4206_v34 = vld [vmem:[%s3429_s12 + $0xc0] sm:$0xf]  ;;  %2940 = vmatmul.mubr.msk.bf16.gmra.mrb[24].mxu1 %vm1340_vm6, %v4158_v12 }
  0xa7   : > { %1292 = vrot.lane.b32.xlu0 %v4113_v45, %s3354_s19  ;;  %1917 = vmatprep.mubr.bf16.mxu0 %v1555_v31  ;;  %v1427_v43 = vsel %vm1422_vm8, %v1393_v47, %v1200_v7  ;;  %v1349_v62 = vsel %vm1340_vm6, %v3449_v10, %v1087_v8  ;;  %v734_v32 = vrot.slane %v732_v38, 4  ;;  %v737_v27 = vrot.slane %v735_v18, 5 }
  0xa8   : > { %1219 = vrot.lane.b32.xlu1 %v4044_v33, %s3355_s26  ;;  %v720_v3 = vsel %vm3521_vm5, %v715_v61, %v4122_v58  ;;  %v4192_v10 = vrot.slane %v741_v9, 5  ;;  %v747_v31 = vrot.slane %v745_v57, 4  ;;  %v4214_v61 = vld [vmem:[%s3429_s12 + $0xc4] sm:$0xf]  ;;  %v913_v18 = vrot.slane %v4153_v50, 5  ;;  %2220 = vmatprep.mubr.bf16.mxu1 %v4975_v20 }
  0xa9   : > { %v1240_v5 = vpop.permute.xlu0 %1239  ;;  %2071 = vmatpush1.bf16.msra.mxu0 %v3818_v30  ;;  %v725_v30 = vrot.slane %v724_v23, 4  ;;  %v907_v23 = vsel %vm3477_vm4, %v2835_v63, %v906_v6  ;;  %v932_v9 = vshrl.u32 %v4214_v61, 16 }
  0xaa   : > { %v1167_v26 = vpop.permute.xlu1 %1166  ;;  %v1479_v55 = vsel %vm1340_vm6, %v3620_v11, %v1240_v5  ;;  %v910_v5 = vsel %vm3477_vm4, %v908_v59, %v909_v44  ;;  %v748_v47 = vor.u32 %v747_v31, %v4192_v10 }
  0xab   : > { %1327 = vrot.lane.b32.xlu0 %v4143_v54, %s3355_s26  ;;  %v730_v35 = vsel %vm3521_vm5, %v725_v30, %v729_v14  ;;  %v1395_v58 = vsel %vm1389_vm7, %v1349_v62, %v1167_v26  ;;  %v738_v26 = vor.u32 %v737_v27, %v734_v32  ;;  %v919_v30 = vshrl.u32 %v4206_v34, 16 }
  0xac   : > { %1918 = vmatmul.mubr.bf16.gmra.mrb[4].mxu0 %v1427_v43  ;;  %1106 = vrot.lane.b32.xlu1 %v4068_v52, %s3356_s27  ;;  %v4201_v13 = vcombine.low %v720_v3, %v730_v35  ;;  %v751_v43 = vshll.u32 %v361_v36, 16  ;;  %v922_v14 = vshll.u32 %v4206_v34, 16  ;;  %v4224_v57 = vcombine.low %v907_v23, %v910_v5 }
  0xad   : > { %v1275_v39 = vpop.permute.xlu0 %1274  ;;  %v749_v63 = vrot.slane %v748_v47, 4  ;;  %v2836_v62 = vrot.slane %v4150_v41, 9  ;;  %v915_v3 = vrot.slane %v913_v18, 4  ;;  %v916_v32 = vrot.slane %v361_v36, 5 }
  0xae   : > { %v1202_v7 = vpop.permute.xlu1 %1201  ;;  %v1524_v8 = vsel %vm1389_vm7, %v1479_v55, %v1275_v39  ;;  %v928_v39 = vshll.u32 %v4214_v61, 16  ;;  %v753_v59 = vrot.slane %v751_v43, 5  ;;  %v921_v55 = vrot.slane %v919_v30, 4  ;;  %2941 = vmatmul.mubr.msk.bf16.gmra.mrb[28].mxu1 %vm1340_vm6, %v4224_v57 }
  0xaf   : > { %1259 = vrot.lane.b32.xlu0 %v4158_v12, %s3356_s27  ;;  %v924_v35 = vrot.slane %v922_v14, 5  ;;  %v917_v23 = vsel %vm3477_vm4, %v915_v3, %v916_v32  ;;  %2230 = vmatprep.mubr.bf16.mxu1 %v4975_v20  ;;  %v4274_v14 = vld [vmem:[%s3429_s12 + $0xd0] sm:$0xf] }
  0xb0   : > { %1186 = vrot.lane.b32.xlu1 %v4088_v48, %s3354_s19  ;;  %v1430_v48 = vsel %vm1422_vm8, %v1395_v58, %v1202_v7  ;;  %v739_v7 = vrot.slane %v738_v26, 4  ;;  %v4240_v58 = vrot.slane %v928_v39, 5 }
  0xb1   : > { %v1310_v4 = vpop.permute.xlu0 %1309  ;;  %v925_v5 = vor.u32 %v924_v35, %v921_v55  ;;  %v966_v55 = vshrl.u32 %v4274_v14, 16  ;;  %v962_v35 = vshll.u32 %v4274_v14, 16 }
  0xb2   : > { %v1558_v21 = vsel %vm1422_vm8, %v1524_v8, %v1310_v4  ;;  %v1089_v11 = vpop.permute.xlu1 %1088  ;;  %v4237_v8 = vcombine.low %v4150_v41, %v4153_v50  ;;  %v364_v4 = vld [vmem:[%s3429_s12 + $0xc8] sm:$0x1] }
  0xb3   : > { %1294 = vrot.lane.b32.xlu0 %v4174_v19, %s3354_s19  ;;  %1927 = vmatprep.mubr.bf16.mxu0 %v1558_v21  ;;  %v1352_v31 = vsel %vm1340_vm6, %v3462_v16, %v1089_v11  ;;  %v934_v21 = vrot.slane %v932_v9, 4  ;;  %v744_v16 = vsel %vm3521_vm5, %v739_v7, %v4192_v10  ;;  %v754_v11 = vsel %vm3521_vm5, %v749_v63, %v753_v59 }
  0xb4   : > { %1928 = vmatmul.mubr.bf16.gmra.mrb[8].mxu0 %v1430_v48  ;;  %1221 = vrot.lane.b32.xlu1 %v4113_v45, %s3355_s26  ;;  %v914_v48 = vsel %vm3477_vm4, %v2836_v62, %v913_v18  ;;  %v938_v26 = vshll.u32 %v364_v4, 16  ;;  %v4264_v43 = vcombine.low %v744_v16, %v754_v11  ;;  %v947_v18 = vrot.slane %v4214_v61, 5 }
  0xb5   : > { %v1242_v38 = vpop.permute.xlu0 %1241  ;;  %v4276_v39 = vcombine.low %v914_v48, %v917_v23  ;;  %v926_v7 = vrot.slane %v925_v5, 4  ;;  %v2837_v63 = vrot.slane %v4206_v34, 9  ;;  %v950_v59 = vrot.slane %v364_v4, 5 }
  0xb6   : > { %v1169_v6 = vpop.permute.xlu1 %1168  ;;  %v1482_v36 = vsel %vm1340_vm6, %v3668_v15, %v1242_v38  ;;  %v935_v38 = vor.u32 %v934_v21, %v4240_v58  ;;  %v940_v62 = vrot.slane %v938_v26, 5  ;;  %v949_v3 = vrot.slane %v947_v18, 4 }
  0xb7   : > { %1329 = vrot.lane.b32.xlu0 %v4201_v13, %s3355_s26  ;;  %v1397_v15 = vsel %vm1389_vm7, %v1352_v31, %v1169_v6  ;;  %v4271_v6 = vld [vmem:[%s3429_s12 + $0xcc] sm:$0xf]  ;;  %2942 = vmatmul.mubr.msk.bf16.gmra.mrb[32].mxu1 %vm1340_vm6, %v4276_v39  ;;  %v4291_v21 = vcombine.low %v4206_v34, %v4214_v61  ;;  %v948_v16 = vsel %vm3477_vm4, %v2837_v63, %v947_v18  ;;  %v964_v48 = vrot.slane %v962_v35, 5 }
  0xb8   : > { %1108 = vrot.lane.b32.xlu1 %v4143_v54, %s3356_s27  ;;  %v953_v32 = vshrl.u32 %v4271_v6, 16  ;;  %2240 = vmatprep.mubr.bf16.mxu1 %v4975_v20  ;;  %v951_v61 = vsel %vm3477_vm4, %v949_v3, %v950_v59  ;;  %v968_v23 = vrot.slane %v966_v55, 4 }
  0xb9   : > { %v1277_v44 = vpop.permute.xlu0 %1276  ;;  %v2889_v18 = vcombine.low %v948_v16, %v951_v61 }
  0xba   : > { %v1204_v27 = vpop.permute.xlu1 %1203  ;;  %v1526_v41 = vsel %vm1389_vm7, %v1482_v36, %v1277_v44  ;;  %v936_v44 = vrot.slane %v935_v38, 4  ;;  %v931_v36 = vsel %vm3521_vm5, %v926_v7, %v4240_v58  ;;  %v2838_v38 = vrot.slane %v4271_v6, 9 }
  0xbb   : > { %1261 = vrot.lane.b32.xlu0 %v4224_v57, %s3356_s27  ;;  %v1433_v47 = vsel %vm1422_vm8, %v1397_v15, %v1204_v27  ;;  %v956_v27 = vshll.u32 %v4271_v6, 16  ;;  %v969_v7 = vor.u32 %v968_v23, %v964_v48 }
  0xbc   : > { %1188 = vrot.lane.b32.xlu1 %v4158_v12, %s3354_s19  ;;  %v941_v34 = vsel %vm3521_vm5, %v936_v44, %v940_v62 }
  0xbd   : > { %v1312_v50 = vpop.permute.xlu0 %1311  ;;  %v970_v55 = vrot.slane %v969_v7, 4 }
  0xbe   : > { %v1561_v12 = vsel %vm1422_vm8, %v1526_v41, %v1312_v50  ;;  %v1091_v10 = vpop.permute.xlu1 %1090  ;;  %v955_v41 = vrot.slane %v953_v32, 4  ;;  %v958_v50 = vrot.slane %v956_v27, 5 }
  0xbf   : > { %1296 = vrot.lane.b32.xlu0 %v4237_v8, %s3354_s19  ;;  %1937 = vmatprep.mubr.bf16.mxu0 %v1561_v12  ;;  %v1355_v11 = vsel %vm1340_vm6, %v3644_v17, %v1091_v10  ;;  %v981_v12 = vrot.slane %v4274_v14, 5  ;;  %v367_v10 = vld [vmem:[%s3429_s12 + $0xd4] sm:$0x1]  ;;  %s2965_s12 = sshll.u32 %s5007_s21, 3 }
  0xc0   : > { %1938 = vmatmul.mubr.bf16.gmra.mrb[12].mxu0 %v1433_v47  ;;  %1223 = vrot.lane.b32.xlu1 %v4174_v19, %s3355_s26  ;;  %v972_v63 = vshll.u32 %v367_v10, 16 }
  0xc1   : > { %v1244_v30 = vpop.permute.xlu0 %1243  ;;  %2943 = vmatmul.mubr.msk.bf16.gmra.mrb[36].mxu1 %vm1340_vm6, %v2889_v18  ;;  %v983_v44 = vrot.slane %v981_v12, 4  ;;  %v982_v3 = vsel %vm3477_vm4, %v2838_v38, %v981_v12 }
  0xc2   : > { %v1171_v9 = vpop.permute.xlu1 %1170  ;;  %v1485_v58 = vsel %vm1340_vm6, %v3730_v37, %v1244_v30  ;;  %v984_v30 = vrot.slane %v367_v10, 5  ;;  %2250 = vmatprep.mubr.bf16.mxu1 %v4975_v20  ;;  %v974_v35 = vrot.slane %v972_v63, 5 }
  0xc3   : > { %1331 = vrot.lane.b32.xlu0 %v4264_v43, %s3355_s26  ;;  %v1399_v5 = vsel %vm1389_vm7, %v1355_v11, %v1171_v9  ;;  %v959_v9 = vor.u32 %v958_v50, %v955_v41  ;;  %v2890_v11 = vcombine.low %v4271_v6, %v4274_v14 }
  0xc4   : > { %1110 = vrot.lane.b32.xlu1 %v4201_v13, %s3356_s27  ;;  %v985_v32 = vsel %vm3477_vm4, %v983_v44, %v984_v30  ;;  %v975_v61 = vsel %vm3521_vm5, %v970_v55, %v974_v35 }
  0xc5   : > { %v1279_v31 = vpop.permute.xlu0 %1278  ;;  %v960_v27 = vrot.slane %v959_v9, 4 }
  0xc6   : > { %v1206_v4 = vpop.permute.xlu1 %1205  ;;  %v1528_v17 = vsel %vm1389_vm7, %v1485_v58, %v1279_v31 }
  0xc7   : > { %1263 = vrot.lane.b32.xlu0 %v4276_v39, %s3356_s27  ;;  %v1436_v37 = vsel %vm1422_vm8, %v1399_v5, %v1206_v4  ;;  %v2892_v4 = vcombine.low %v982_v3, %v985_v32 }
  0xc8   : > { %1190 = vrot.lane.b32.xlu1 %v4224_v57, %s3354_s19  ;;  %v4320_v57 = vcombine.low %v931_v36, %v941_v34  ;;  %v965_v34 = vsel %vm3521_vm5, %v960_v27, %v964_v48 }
  0xc9   : > { %v1314_v15 = vpop.permute.xlu0 %1313  ;;  %2944 = vmatmul.mubr.msk.bf16.gmra.mrb[40].mxu1 %vm1340_vm6, %v2892_v4 }
  0xca   : > { %v1564_v26 = vsel %vm1422_vm8, %v1528_v17, %v1314_v15  ;;  %v1093_v47 = vpop.permute.xlu1 %1092 }
  0xcb   : > { %1298 = vrot.lane.b32.xlu0 %v4291_v21, %s3354_s19  ;;  %1947 = vmatprep.mubr.bf16.mxu0 %v1564_v26  ;;  %v1358_v16 = vsel %vm1340_vm6, %v3704_v29, %v1093_v47 }
  0xcc   : > { %1948 = vmatmul.mubr.bf16.gmra.mrb[16].mxu0 %v1436_v37  ;;  %1225 = vrot.lane.b32.xlu1 %v4237_v8, %s3355_s26 }
  0xcd   : > { %v1246_v59 = vpop.permute.xlu0 %1245 }
  0xce   : > { %v1173_v62 = vpop.permute.xlu1 %1172  ;;  %v1488_v24 = vsel %vm1340_vm6, %v3795_v28, %v1246_v59 }
  0xcf   : > { %1333 = vrot.lane.b32.xlu0 %v4320_v57, %s3355_s26  ;;  %v1401_v58 = vsel %vm1389_vm7, %v1358_v16, %v1173_v62 }
  0xd0   : > { %1112 = vrot.lane.b32.xlu1 %v4264_v43, %s3356_s27 }
  0xd1   : > { %v1281_v31 = vpop.permute.xlu0 %1280 }
  0xd2   : > { %v1208_v36 = vpop.permute.xlu1 %1207  ;;  %v1530_v41 = vsel %vm1389_vm7, %v1488_v24, %v1281_v31 }
  0xd3   : > { %1265 = vrot.lane.b32.xlu0 %v2889_v18, %s3356_s27  ;;  %v1439_v28 = vsel %vm1422_vm8, %v1401_v58, %v1208_v36  ;;  %s311_s27 = scalar_lea.vmem %s4960_s6, %s2965_s12 }
  0xd4   : > { %1192 = vrot.lane.b32.xlu1 %v4276_v39, %s3354_s19  ;;  %v2891_v39 = vcombine.low %v965_v34, %v975_v61 }
  0xd5   : > { %v1316_v29 = vpop.permute.xlu0 %1315 }
  0xd6   : > { %v1567_v6 = vsel %vm1422_vm8, %v1530_v41, %v1316_v29  ;;  %v1095_v14 = vpop.permute.xlu1 %1094 }
  0xd7   : > { %1300 = vrot.lane.b32.xlu0 %v2890_v11, %s3354_s19  ;;  %1957 = vmatprep.mubr.bf16.mxu0 %v1567_v6  ;;  %v1361_v17 = vsel %vm1340_vm6, %v3766_v56, %v1095_v14 }
  0xd8   : > { %1958 = vmatmul.mubr.bf16.gmra.mrb[20].mxu0 %v1439_v28  ;;  %1227 = vrot.lane.b32.xlu1 %v4291_v21, %s3355_s26 }
  0xd9   : > { %v1248_v0 = vpop.permute.xlu0 %1247 }
  0xda   : > { %v1175_v50 = vpop.permute.xlu1 %1174  ;;  %v1491_v15 = vsel %vm1340_vm6, %v3849_v42, %v1248_v0 }
  0xdb   : > { %1335 = vrot.lane.b32.xlu0 %v2891_v39, %s3355_s26  ;;  %v1403_v5 = vsel %vm1389_vm7, %v1361_v17, %v1175_v50 }
  0xdd   : > { %v1283_v48 = vpop.permute.xlu0 %1282 }
  0xde   : > { %v1210_v23 = vpop.permute.xlu1 %1209  ;;  %v1532_v12 = vsel %vm1389_vm7, %v1491_v15, %v1283_v48 }
  0xdf   : > { %v1442_v47 = vsel %vm1422_vm8, %v1403_v5, %v1210_v23 }
  0xe1   : > { %v1318_v10 = vpop.permute.xlu0 %1317 }
  0xe2   : > { %v1570_v26 = vsel %vm1422_vm8, %v1532_v12, %v1318_v10  ;;  %v1097_v21 = vpop.permute.xlu1 %1096 }
  0xe3   : > { %1967 = vmatprep.mubr.bf16.mxu0 %v1570_v26  ;;  %v1364_v56 = vsel %vm1340_vm6, %v3838_v46, %v1097_v21 }
  0xe4   : > { %1968 = vmatmul.mubr.bf16.gmra.mrb[24].mxu0 %v1442_v47 }
  0xe5   : > { %v1250_v38 = vpop.permute.xlu0 %1249 }
  0xe6   : > { %v1177_v37 = vpop.permute.xlu1 %1176  ;;  %v1494_v42 = vsel %vm1340_vm6, %v3892_v40, %v1250_v38 }
  0xe7   : > { %v1405_v63 = vsel %vm1389_vm7, %v1364_v56, %v1177_v37 }
  0xe9   : > { %v1285_v18 = vpop.permute.xlu0 %1284 }
  0xea   : > { %v1212_v30 = vpop.permute.xlu1 %1211  ;;  %v1534_v9 = vsel %vm1389_vm7, %v1494_v42, %v1285_v18 }
  0xeb   : > { %v1445_v62 = vsel %vm1422_vm8, %v1405_v63, %v1212_v30 }
  0xed   : > { %v1320_v7 = vpop.permute.xlu0 %1319 }
  0xee   : > { %v1573_v59 = vsel %vm1422_vm8, %v1534_v9, %v1320_v7  ;;  %v1099_v44 = vpop.permute.xlu1 %1098 }
  0xef   : > { %1977 = vmatprep.mubr.bf16.mxu0 %v1573_v59  ;;  %v1367_v46 = vsel %vm1340_vm6, %v3876_v22, %v1099_v44 }
  0xf0   : > { %1978 = vmatmul.mubr.bf16.gmra.mrb[28].mxu0 %v1445_v62 }
  0xf1   : > { %v1252_v3 = vpop.permute.xlu0 %1251 }
  0xf2   : > { %v1179_v32 = vpop.permute.xlu1 %1178  ;;  %v1497_v40 = vsel %vm1340_vm6, %v3923_v25, %v1252_v3 }
  0xf3   : > { %v1407_v4 = vsel %vm1389_vm7, %v1367_v46, %v1179_v32 }
  0xf5   : > { %v1287_v27 = vpop.permute.xlu0 %1286 }
  0xf6   : > { %v1214_v55 = vpop.permute.xlu1 %1213  ;;  %v1536_v35 = vsel %vm1389_vm7, %v1497_v40, %v1287_v27 }
  0xf7   : > { %v1448_v11 = vsel %vm1422_vm8, %v1407_v4, %v1214_v55 }
  0xf9   : > { %v1322_v31 = vpop.permute.xlu0 %1321 }
  0xfa   : > { %v1576_v36 = vsel %vm1422_vm8, %v1536_v35, %v1322_v31  ;;  %v1101_v16 = vpop.permute.xlu1 %1100 }
  0xfb   : > { %1987 = vmatprep.mubr.bf16.mxu0 %v1576_v36  ;;  %v1370_v22 = vsel %vm1340_vm6, %v3909_v1, %v1101_v16 }
  0xfc   : > { %1988 = vmatmul.mubr.bf16.gmra.mrb[32].mxu0 %v1448_v11 }
  0xfd   : > { %v1254_v24 = vpop.permute.xlu0 %1253 }
  0xfe   : > { %v1181_v34 = vpop.permute.xlu1 %1180  ;;  %v1500_v25 = vsel %vm1340_vm6, %v3963_v2, %v1254_v24 }
  0xff   : > { %v1409_v6 = vsel %vm1389_vm7, %v1370_v22, %v1181_v34 }
 0x101   : > { %v1289_v61 = vpop.permute.xlu0 %1288 }
 0x102   : > { %v1216_v41 = vpop.permute.xlu1 %1215  ;;  %v1538_v29 = vsel %vm1389_vm7, %v1500_v25, %v1289_v61 }
 0x103   : > { %v1451_v39 = vsel %vm1422_vm8, %v1409_v6, %v1216_v41 }
 0x105   : > { %v1324_v58 = vpop.permute.xlu0 %1323 }
 0x106   : > { %v1579_v14 = vsel %vm1422_vm8, %v1538_v29, %v1324_v58  ;;  %v1103_v28 = vpop.permute.xlu1 %1102 }
 0x107   : > { %1997 = vmatprep.mubr.bf16.mxu0 %v1579_v14  ;;  %v1373_v1 = vsel %vm1340_vm6, %v3947_v53, %v1103_v28 }
 0x108   : > { %1998 = vmatmul.mubr.bf16.gmra.mrb[36].mxu0 %v1451_v39 }
 0x109   : > { %v1256_v0 = vpop.permute.xlu0 %1255 }
 0x10a   : > { %v1183_v50 = vpop.permute.xlu1 %1182  ;;  %v1503_v2 = vsel %vm1340_vm6, %v4014_v49, %v1256_v0 }
 0x10b   : > { %v1411_v12 = vsel %vm1389_vm7, %v1373_v1, %v1183_v50 }
 0x10d   : > { %v1291_v48 = vpop.permute.xlu0 %1290 }
 0x10e   : > { %v1218_v23 = vpop.permute.xlu1 %1217  ;;  %v1540_v17 = vsel %vm1389_vm7, %v1503_v2, %v1291_v48 }
 0x10f   : > { %v1454_v26 = vsel %vm1422_vm8, %v1411_v12, %v1218_v23 }
 0x111   : > { %v1326_v15 = vpop.permute.xlu0 %1325 }
 0x112   : > { %v1582_v10 = vsel %vm1422_vm8, %v1540_v17, %v1326_v15  ;;  %v1105_v5 = vpop.permute.xlu1 %1104 }
 0x113   : > { %2007 = vmatprep.mubr.bf16.mxu0 %v1582_v10  ;;  %v1376_v53 = vsel %vm1340_vm6, %v3993_v51, %v1105_v5 }
 0x114   : > { %2008 = vmatmul.mubr.bf16.gmra.mrb[40].mxu0 %v1454_v26 }
 0x115   : > { %v1258_v21 = vpop.permute.xlu0 %1257 }
 0x116   : > { %v1185_v47 = vpop.permute.xlu1 %1184  ;;  %v1506_v49 = vsel %vm1340_vm6, %v4068_v52, %v1258_v21 }
 0x117   : > { %v1413_v56 = vsel %vm1389_vm7, %v1376_v53, %v1185_v47  ;;  %v3312_v47 = vld [vmem:[%s4957_s3 + $0x40] sm:$0xff]  }
 0x118   : > { %2966 = vmatprep.subr.bf16.mxu1 %v3312_v47 }
 0x119   : > { %v1293_v38 = vpop.permute.xlu0 %1292 }
 0x11a   : > { %v1220_v37 = vpop.permute.xlu1 %1219  ;;  %v1542_v18 = vsel %vm1389_vm7, %v1506_v49, %v1293_v38  ;;  %v3313_v38 = vld [vmem:[%s4957_s3] sm:$0xff]  }
 0x11b   : > { %v1457_v7 = vsel %vm1422_vm8, %v1413_v56, %v1220_v37  ;;  %2967 = vmatpush3.bf16.msra.mxu1 %v3313_v38 }
 0x11d   : > { %v1328_v30 = vpop.permute.xlu0 %1327 }
 0x11e   : > { %v1585_v42 = vsel %vm1422_vm8, %v1542_v18, %v1328_v30  ;;  %v1107_v9 = vpop.permute.xlu1 %1106  ;;  %v3314_v30 = vld [vmem:[%s4957_s3 + $0x48] sm:$0xff]  }
 0x11f   : > { %2017 = vmatprep.mubr.bf16.mxu0 %v1585_v42  ;;  %v1379_v51 = vsel %vm1340_vm6, %v4044_v33, %v1107_v9  ;;  %2968 = vmatprep.subr.bf16.mxu1 %v3314_v30  ;;  %v4977_v9 = vld [vmem:[#allocation3_spill] sm:$0xff] }
 0x120   : > { %2018 = vmatmul.mubr.bf16.gmra.mrb[44].mxu0 %v1457_v7 }
 0x121   : > { %v1260_v63 = vpop.permute.xlu0 %1259 }
 0x122   : > { %v1187_v59 = vpop.permute.xlu1 %1186  ;;  %v1509_v52 = vsel %vm1340_vm6, %v4143_v54, %v1260_v63  ;;  %v3315_v63 = vld [vmem:[%s4957_s3 + $0x8] sm:$0xff]  }
 0x123   : > { %v1415_v27 = vsel %vm1389_vm7, %v1379_v51, %v1187_v59  ;;  %2969 = vmatpush3.bf16.msra.mxu1 %v3315_v63  ;;  %v3316_v51 = vld [vmem:[%s4957_s3 + $0x50] sm:$0xff]  }
 0x124   : > { %2970 = vmatprep.subr.bf16.mxu1 %v3316_v51  ;;  %v3326_v51 = vld [vmem:[%s4957_s3 + $0x78] sm:$0xff]  }
 0x125   : > { %v1295_v44 = vpop.permute.xlu0 %1294 }
 0x126   : > { %v1222_v62 = vpop.permute.xlu1 %1221  ;;  %v1544_v3 = vsel %vm1389_vm7, %v1509_v52, %v1295_v44  ;;  %v3317_v52 = vld [vmem:[%s4957_s3 + $0x10] sm:$0xff]  }
 0x127   : > { %v1460_v40 = vsel %vm1422_vm8, %v1415_v27, %v1222_v62  ;;  %2971 = vmatpush3.bf16.msra.mxu1 %v3317_v52  ;;  %v3327_v52 = vld [vmem:[%s4957_s3 + $0x38] sm:$0xff]  }
 0x129   : > { %v1330_v32 = vpop.permute.xlu0 %1329 }
 0x12a   : > { %v1588_v55 = vsel %vm1422_vm8, %v1544_v3, %v1330_v32  ;;  %v1109_v46 = vpop.permute.xlu1 %1108  ;;  %v4978_v3 = vld [vmem:[#allocation4_spill] sm:$0xff] }
 0x12b   : > { %2027 = vmatprep.mubr.bf16.mxu0 %v1588_v55  ;;  %v1382_v33 = vsel %vm1340_vm6, %v4113_v45, %v1109_v46  ;;  %v4979_v55 = vld [vmem:[#allocation5_spill] sm:$0xff] }
 0x12c   : > { %2028 = vmatmul.mubr.bf16.gmra.mrb[48].mxu0 %v1460_v40 }
 0x12d   : > { %v1262_v35 = vpop.permute.xlu0 %1261 }
 0x12e   : > { %v1189_v31 = vpop.permute.xlu1 %1188  ;;  %v1512_v54 = vsel %vm1340_vm6, %v4201_v13, %v1262_v35 }
 0x12f   : > { %v1417_v24 = vsel %vm1389_vm7, %v1382_v33, %v1189_v31 }
 0x131   : > { %v1297_v4 = vpop.permute.xlu0 %1296 }
 0x132   : > { %v1224_v36 = vpop.permute.xlu1 %1223  ;;  %v1546_v16 = vsel %vm1389_vm7, %v1512_v54, %v1297_v4  ;;  %v3318_v4 = vld [vmem:[%s4957_s3 + $0x58] sm:$0xff]  }
 0x133   : > { %v1463_v41 = vsel %vm1422_vm8, %v1417_v24, %v1224_v36  ;;  %v4437_v26 = vpop.f32.mrb[0].mxu1  ;;  %2972 = vmatprep.subr.bf16.mxu1 %v3318_v4  ;;  %v3321_v24 = vld [vmem:[%s4957_s3 + $0x20] sm:$0xff]  }
 0x135   : > { %v1332_v11 = vpop.permute.xlu0 %1331 }
 0x136   : > { %v1591_v34 = vsel %vm1422_vm8, %v1546_v16, %v1332_v11  ;;  %v1111_v61 = vpop.permute.xlu1 %1110  ;;  %v3320_v11 = vld [vmem:[%s4957_s3 + $0x60] sm:$0xff]  }
 0x137   : > { %2037 = vmatprep.mubr.bf16.mxu0 %v1591_v34  ;;  %v1385_v45 = vsel %vm1340_vm6, %v4174_v19, %v1111_v61 }
 0x138   : > { %2038 = vmatmul.mubr.bf16.gmra.mrb[52].mxu0 %v1463_v41 }
 0x139   : > { %v1264_v22 = vpop.permute.xlu0 %1263 }
 0x13a   : > { %v1191_v25 = vpop.permute.xlu1 %1190  ;;  %v1515_v13 = vsel %vm1340_vm6, %v4264_v43, %v1264_v22 }
 0x13b   : > { %v1419_v28 = vsel %vm1389_vm7, %v1385_v45, %v1191_v25 }
 0x13d   : > { %v1299_v29 = vpop.permute.xlu0 %1298 }
 0x13e   : > { %v1226_v58 = vpop.permute.xlu1 %1225  ;;  %v1548_v6 = vsel %vm1389_vm7, %v1515_v13, %v1299_v29  ;;  %v3322_v13 = vld [vmem:[%s4957_s3 + $0x68] sm:$0xff]  }
 0x13f   : > { %v1466_v50 = vsel %vm1422_vm8, %v1419_v28, %v1226_v58 }
 0x141   : > { %v1334_v14 = vpop.permute.xlu0 %1333 }
 0x142   : > { %v1594_v39 = vsel %vm1422_vm8, %v1548_v6, %v1334_v14  ;;  %v1113_v0 = vpop.permute.xlu1 %1112  ;;  %v3323_v6 = vld [vmem:[%s4957_s3 + $0x28] sm:$0xff]  }
 0x143   : > { %2047 = vmatprep.mubr.bf16.mxu0 %v1594_v39  ;;  %v1388_v19 = vsel %vm1340_vm6, %v4237_v8, %v1113_v0  ;;  %v4439_v8 = vpop.f32.mrb[1].mxu1 }
 0x144   : > { %2048 = vmatmul.mubr.bf16.gmra.mrb[56].mxu0 %v1466_v50  ;;  %v1637_v50 = vlaneseq }
 0x145   : > { %v1266_v48 = vpop.permute.xlu0 %1265 }
 0x146   : > { %v1193_v23 = vpop.permute.xlu1 %1192  ;;  %v1518_v43 = vsel %vm1340_vm6, %v4320_v57, %v1266_v48  ;;  %v4443_v57 = vpop.f32.mrb[2].mxu1  ;;  %v3324_v48 = vld [vmem:[%s4957_s3 + $0x70] sm:$0xff]  }
 0x147   : > { %v1421_v12 = vsel %vm1389_vm7, %v1388_v19, %v1193_v23  ;;  %v4446_v21 = vpop.f32.mrb[3].mxu1  ;;  %v3325_v23 = vld [vmem:[%s4957_s3 + $0x30] sm:$0xff]  }
 0x148   : > { %v4454_v37 = vpop.f32.mrb[4].mxu1 }
 0x149   : > { %v1301_v1 = vpop.permute.xlu0 %1300  ;;  %v4456_v53 = vpop.f32.mrb[5].mxu1 }
 0x14a   : > { %v1228_v2 = vpop.permute.xlu1 %1227  ;;  %v1550_v17 = vsel %vm1389_vm7, %v1518_v43, %v1301_v1  ;;  %v4460_v49 = vpop.f32.mrb[6].mxu1  ;;  %v1638_v1 = vshrl.u32 %v1637_v50, 7 }
 0x14b   : > { %v1469_v5 = vsel %vm1422_vm8, %v1421_v12, %v1228_v2  ;;  %v4463_v18 = vpop.f32.mrb[7].mxu1  ;;  %v1635_v12 = vld [vmem:[%s4956_s2] sm:$0x3] }
 0x14c   : > { %v4468_v56 = vpop.f32.mrb[8].mxu1 }
 0x14d   : > { %v1336_v15 = vpop.permute.xlu0 %1335  ;;  %v4470_v42 = vpop.f32.mrb[9].mxu1 }
 0x14e   : > { %v1597_v10 = vsel %vm1422_vm8, %v1550_v17, %v1336_v15  ;;  %v4474_v7 = vpop.f32.mrb[10].mxu1  ;;  %v1639_v15 = vsub.s32 0, %v1638_v1 }
 0x14f   : > { %2057 = vmatprep.mubr.bf16.mxu0 %v1597_v10  ;;  %v4480_v59 = vpop.f32.mrb[11].mxu1  ;;  %v1643_v10 = vsub.s32 1, %v1638_v1 }
 0x150   : > { %2058 = vmatmul.mubr.bf16.gmra.mrb[60].mxu0 %v1469_v5  ;;  %v4482_v44 = vpop.f32.mrb[12].mxu1  ;;  %v4576_v5 = vrot.slane %v1635_v12, %v1639_v15 }
 0x151   : > { %2100 = vmatprep.mubr.bf16.mxu0 %v4975_v20  ;;  %v4484_v62 = vpop.f32.mrb[13].mxu1  ;;  %v4580_v38 = vrot.slane %v1635_v12, %v1643_v10 }
 0x152   : > { %v4494_v32 = vpop.f32.mrb[14].mxu1 }
 0x153   : > { %v4497_v27 = vpop.f32.mrb[15].mxu1 }
 0x158   : > { %2929 = vmatmul.mubr.msk.bf16.vlgmr.msra.gmra.mrb[0].mxu0 %vm1340_vm6, %v3516_v60  ;;  %v4976_v60 = vld [vmem:[#allocation2_spill] sm:$0xff] }
 0x159   : > { %2110 = vmatprep.mubr.bf16.mxu0 %v4975_v20 }
 0x160   : > { %2930 = vmatmul.mubr.msk.bf16.gmra.mrb[4].mxu0 %vm1340_vm6, %v4976_v60 }
 0x161   : > { %2120 = vmatprep.mubr.bf16.mxu0 %v4975_v20 }
 0x163   : > { %v4501_v46 = vpop.f32.mrb[16].mxu1 }
 0x164   : > { %v4503_v40 = vpop.f32.mrb[17].mxu1 }
 0x165   : > { %v4505_v35 = vpop.f32.mrb[18].mxu1 }
 0x166   : > { %v4507_v31 = vpop.f32.mrb[19].mxu1 }
 0x168   : > { %2931 = vmatmul.mubr.msk.bf16.gmra.mrb[8].mxu0 %vm1340_vm6, %v4977_v9 }
 0x169   : > { %2130 = vmatprep.mubr.bf16.mxu0 %v4975_v20 }
 0x16b   : > { %v4515_v36 = vpop.f32.mrb[20].mxu1 }
 0x16c   : > { %v4517_v33 = vpop.f32.mrb[21].mxu1 }
 0x16d   : > { %v4519_v54 = vpop.f32.mrb[22].mxu1 }
 0x16e   : > { %v4521_v16 = vpop.f32.mrb[23].mxu1 }
 0x170   : > { %2932 = vmatmul.mubr.msk.bf16.gmra.mrb[12].mxu0 %vm1340_vm6, %v4978_v3 }
 0x171   : > { %2140 = vmatprep.mubr.bf16.mxu0 %v4975_v20  ;;  %v3319_v20 = vld [vmem:[%s4957_s3 + $0x18] sm:$0xff]  }
 0x172   : > { %2973 = vmatpush3.bf16.msra.mxu1 %v3319_v20 }
 0x173   : > { %2974 = vmatprep.subr.bf16.mxu1 %v3320_v11 }
 0x176   : > { %2975 = vmatpush3.bf16.msra.mxu1 %v3321_v24 }
 0x177   : > { %2976 = vmatprep.subr.bf16.mxu1 %v3322_v13 }
 0x178   : > { %2933 = vmatmul.mubr.msk.bf16.gmra.mrb[16].mxu0 %vm1340_vm6, %v4979_v55 }
 0x179   : > { %v4529_v34 = vpop.f32.mrb[24].mxu1 }
 0x17a   : > { %v4531_v61 = vpop.f32.mrb[25].mxu1  ;;  %2977 = vmatpush3.bf16.msra.mxu1 %v3323_v6 }
 0x17b   : > { %v4533_v41 = vpop.f32.mrb[26].mxu1  ;;  %2978 = vmatprep.subr.bf16.mxu1 %v3324_v48 }
 0x17c   : > { %v4535_v22 = vpop.f32.mrb[27].mxu1 }
 0x17e   : > { %2979 = vmatpush3.bf16.msra.mxu1 %v3325_v23 }
 0x17f   : > { %2980 = vmatprep.subr.bf16.mxu1 %v3326_v51 }
 0x181   : > { %v4537_v25 = vpop.f32.mrb[28].mxu1 }
 0x182   : > { %v4539_v29 = vpop.f32.mrb[29].mxu1  ;;  %2981 = vmatpush3.bf16.msra.mxu1 %v3327_v52 }
 0x183   : > { %v4541_v58 = vpop.f32.mrb[30].mxu1 }
 0x184   : > { %v4543_v45 = vpop.f32.mrb[31].mxu1 }
 0x18a   : > { %v4551_v14 = vpop.f32.mrb[32].mxu1 }
 0x18b   : > { %v4553_v28 = vpop.f32.mrb[33].mxu1 }
 0x18c   : > { %v4555_v39 = vpop.f32.mrb[34].mxu1 }
 0x18d   : > { %v4557_v0 = vpop.f32.mrb[35].mxu1 }
 0x194   : > { %v4565_v19 = vpop.f32.mrb[36].mxu1 }
 0x195   : > { %v4567_v43 = vpop.f32.mrb[37].mxu1 }
 0x196   : > { %v4569_v2 = vpop.f32.mrb[38].mxu1 }
 0x197   : > { %v4571_v17 = vpop.f32.mrb[39].mxu1 }
 0x19c   : > { %v4578_v47 = vpop.f32.mrb[40].mxu1 }
 0x19d   : > { %v4582_v60 = vpop.f32.mrb[41].mxu1 }
 0x19e   : > { %v4584_v30 = vpop.f32.mrb[42].mxu1 }
 0x19f   : > { %v4586_v63 = vpop.f32.mrb[43].mxu1 }
 0x1ab   : > { %v1959_v9 = vpop.f32.mrb[20].mxu0 }
 0x1ac   : > { %v1960_v3 = vadd.f32 %v1959_v9, %v4576_v5  ;;  %v1961_v55 = vpop.f32.mrb[21].mxu0 }
 0x1ad   : > { %v1962_v4 = vadd.f32 %v1961_v55, %v4580_v38  ;;  %v1963_v20 = vpop.f32.mrb[22].mxu0 }
 0x1ae   : > { %v1964_v11 = vadd.f32 %v1963_v20, %v4576_v5  ;;  %v4598_v24 = vadd.f32 %v4437_v26, %v1960_v3  ;;  %v1965_v13 = vpop.f32.mrb[23].mxu0 }
 0x1af   : > { %v1966_v6 = vadd.f32 %v1965_v13, %v4580_v38  ;;  %v4602_v50 = vadd.f32 %v4439_v8, %v1962_v4 }
 0x1b0   : > { %v4605_v48 = vadd.f32 %v4443_v57, %v1964_v11 }
 0x1b1   : > { %v4608_v23 = vadd.f32 %v4446_v21, %v1966_v6 }
 0x1b7   : > { %v1969_v15 = vpop.f32.mrb[24].mxu0 }
 0x1b8   : > { %v1970_v12 = vadd.f32 %v1969_v15, %v4576_v5  ;;  %v1971_v10 = vpop.f32.mrb[25].mxu0 }
 0x1b9   : > { %v1972_v9 = vadd.f32 %v1971_v10, %v4580_v38  ;;  %v1973_v8 = vpop.f32.mrb[26].mxu0 }
 0x1ba   : > { %v1974_v51 = vadd.f32 %v1973_v8, %v4576_v5  ;;  %v4618_v57 = vadd.f32 %v4454_v37, %v1970_v12  ;;  %v1975_v21 = vpop.f32.mrb[27].mxu0 }
 0x1bb   : > { %v1976_v52 = vadd.f32 %v1975_v21, %v4580_v38  ;;  %v4622_v3 = vadd.f32 %v4456_v53, %v1972_v9 }
 0x1bc   : > { %v4625_v55 = vadd.f32 %v4460_v49, %v1974_v51 }
 0x1bd   : > { %v4628_v4 = vadd.f32 %v4463_v18, %v1976_v52 }
 0x1c3   : > { %v1979_v37 = vpop.f32.mrb[28].mxu0 }
 0x1c4   : > { %v1980_v13 = vadd.f32 %v1979_v37, %v4576_v5  ;;  %v1981_v6 = vpop.f32.mrb[29].mxu0 }
 0x1c5   : > { %v1982_v15 = vadd.f32 %v1981_v6, %v4580_v38  ;;  %v1983_v53 = vpop.f32.mrb[30].mxu0 }
 0x1c6   : > { %v1984_v12 = vadd.f32 %v1983_v53, %v4576_v5  ;;  %v4638_v49 = vadd.f32 %v4468_v56, %v1980_v13  ;;  %v1985_v18 = vpop.f32.mrb[31].mxu0 }
 0x1c7   : > { %v1986_v10 = vadd.f32 %v1985_v18, %v4580_v38  ;;  %v4642_v9 = vadd.f32 %v4470_v42, %v1982_v15 }
 0x1c8   : > { %v4645_v8 = vadd.f32 %v4474_v7, %v1984_v12 }
 0x1c9   : > { %v4648_v51 = vadd.f32 %v4480_v59, %v1986_v10 }
 0x1cf   : > { %v1989_v56 = vpop.f32.mrb[32].mxu0 }
 0x1d0   : > { %v1990_v37 = vadd.f32 %v1989_v56, %v4576_v5  ;;  %v1991_v13 = vpop.f32.mrb[33].mxu0 }
 0x1d1   : > { %v1992_v6 = vadd.f32 %v1991_v13, %v4580_v38  ;;  %v1993_v42 = vpop.f32.mrb[34].mxu0 }
 0x1d2   : > { %v1994_v15 = vadd.f32 %v1993_v42, %v4576_v5  ;;  %v4658_v7 = vadd.f32 %v4482_v44, %v1990_v37  ;;  %v1995_v59 = vpop.f32.mrb[35].mxu0 }
 0x1d3   : > { %v1996_v53 = vadd.f32 %v1995_v59, %v4580_v38  ;;  %v4662_v12 = vadd.f32 %v4484_v62, %v1992_v6 }
 0x1d4   : > { %v4665_v18 = vadd.f32 %v4494_v32, %v1994_v15 }
 0x1d5   : > { %v4668_v10 = vadd.f32 %v4497_v27, %v1996_v53 }
 0x1db   : > { %v1999_v44 = vpop.f32.mrb[36].mxu0 }
 0x1dc   : > { %v2000_v37 = vadd.f32 %v1999_v44, %v4576_v5  ;;  %v2001_v42 = vpop.f32.mrb[37].mxu0 }
 0x1dd   : > { %v2002_v59 = vadd.f32 %v2001_v42, %v4580_v38  ;;  %v2003_v62 = vpop.f32.mrb[38].mxu0 }
 0x1de   : > { %v2004_v6 = vadd.f32 %v2003_v62, %v4576_v5  ;;  %v4678_v32 = vadd.f32 %v4501_v46, %v2000_v37  ;;  %v2005_v27 = vpop.f32.mrb[39].mxu0 }
 0x1df   : > { %v2006_v15 = vadd.f32 %v2005_v27, %v4580_v38  ;;  %v4682_v53 = vadd.f32 %v4503_v40, %v2002_v59 }
 0x1e0   : > { %v4685_v56 = vadd.f32 %v4505_v35, %v2004_v6 }
 0x1e1   : > { %v4688_v44 = vadd.f32 %v4507_v31, %v2006_v15 }
 0x1e7   : > { %v2009_v46 = vpop.f32.mrb[40].mxu0 }
 0x1e8   : > { %v2010_v37 = vadd.f32 %v2009_v46, %v4576_v5  ;;  %v2011_v13 = vpop.f32.mrb[41].mxu0 }
 0x1e9   : > { %v2012_v27 = vadd.f32 %v2011_v13, %v4580_v38  ;;  %v2013_v40 = vpop.f32.mrb[42].mxu0 }
 0x1ea   : > { %v2014_v59 = vadd.f32 %v2013_v40, %v4576_v5  ;;  %v4698_v35 = vadd.f32 %v4515_v36, %v2010_v37  ;;  %v2015_v31 = vpop.f32.mrb[43].mxu0 }
 0x1eb   : > { %v2016_v6 = vadd.f32 %v2015_v31, %v4580_v38  ;;  %v4702_v15 = vadd.f32 %v4517_v33, %v2012_v27 }
 0x1ec   : > { %v4705_v42 = vadd.f32 %v4519_v54, %v2014_v59 }
 0x1ed   : > { %v4708_v46 = vadd.f32 %v4521_v16, %v2016_v6 }
 0x1f3   : > { %v2019_v36 = vpop.f32.mrb[44].mxu0 }
 0x1f4   : > { %v2020_v37 = vadd.f32 %v2019_v36, %v4576_v5  ;;  %v2021_v62 = vpop.f32.mrb[45].mxu0 }
 0x1f5   : > { %v2022_v31 = vadd.f32 %v2021_v62, %v4580_v38  ;;  %v2023_v33 = vpop.f32.mrb[46].mxu0 }
 0x1f6   : > { %v2024_v27 = vadd.f32 %v2023_v33, %v4576_v5  ;;  %v4718_v54 = vadd.f32 %v4529_v34, %v2020_v37  ;;  %v2025_v16 = vpop.f32.mrb[47].mxu0 }
 0x1f7   : > { %v2026_v59 = vadd.f32 %v2025_v16, %v4580_v38  ;;  %v4722_v6 = vadd.f32 %v4531_v61, %v2022_v31 }
 0x1f8   : > { %v4725_v13 = vadd.f32 %v4533_v41, %v2024_v27 }
 0x1f9   : > { %v4728_v36 = vadd.f32 %v4535_v22, %v2026_v59 }
 0x1ff   : > { %v2029_v34 = vpop.f32.mrb[48].mxu0 }
 0x200   : > { %v2030_v37 = vadd.f32 %v2029_v34, %v4576_v5  ;;  %v2031_v40 = vpop.f32.mrb[49].mxu0 }
 0x201   : > { %v2032_v16 = vadd.f32 %v2031_v40, %v4580_v38  ;;  %v2033_v61 = vpop.f32.mrb[50].mxu0 }
 0x202   : > { %v2034_v31 = vadd.f32 %v2033_v61, %v4576_v5  ;;  %v4738_v41 = vadd.f32 %v4537_v25, %v2030_v37  ;;  %v2035_v22 = vpop.f32.mrb[51].mxu0 }
 0x203   : > { %v2036_v27 = vadd.f32 %v2035_v22, %v4580_v38  ;;  %v4742_v59 = vadd.f32 %v4539_v29, %v2032_v16 }
 0x204   : > { %v4745_v62 = vadd.f32 %v4541_v58, %v2034_v31 }
 0x205   : > { %v4748_v34 = vadd.f32 %v4543_v45, %v2036_v27 }
 0x20b   : > { %v2039_v25 = vpop.f32.mrb[52].mxu0 }
 0x20c   : > { %v2040_v37 = vadd.f32 %v2039_v25, %v4576_v5  ;;  %v2041_v33 = vpop.f32.mrb[53].mxu0 }
 0x20d   : > { %v2042_v22 = vadd.f32 %v2041_v33, %v4580_v38  ;;  %v2043_v29 = vpop.f32.mrb[54].mxu0 }
 0x20e   : > { %v2044_v16 = vadd.f32 %v2043_v29, %v4576_v5  ;;  %v4758_v58 = vadd.f32 %v4551_v14, %v2040_v37  ;;  %v2045_v45 = vpop.f32.mrb[55].mxu0 }
 0x20f   : > { %v2046_v31 = vadd.f32 %v2045_v45, %v4580_v38  ;;  %v4762_v27 = vadd.f32 %v4553_v28, %v2042_v22 }
 0x210   : > { %v4765_v40 = vadd.f32 %v4555_v39, %v2044_v16 }
 0x211   : > { %v4768_v25 = vadd.f32 %v4557_v0, %v2046_v31 }
 0x217   : > { %v2049_v14 = vpop.f32.mrb[56].mxu0 }
 0x218   : > { %v2050_v37 = vadd.f32 %v2049_v14, %v4576_v5  ;;  %v2051_v61 = vpop.f32.mrb[57].mxu0 }
 0x219   : > { %v2052_v45 = vadd.f32 %v2051_v61, %v4580_v38  ;;  %v2053_v28 = vpop.f32.mrb[58].mxu0 }
 0x21a   : > { %v2054_v22 = vadd.f32 %v2053_v28, %v4576_v5  ;;  %v4778_v39 = vadd.f32 %v4565_v19, %v2050_v37  ;;  %v2055_v0 = vpop.f32.mrb[59].mxu0 }
 0x21b   : > { %v2056_v16 = vadd.f32 %v2055_v0, %v4580_v38  ;;  %v4782_v31 = vadd.f32 %v4567_v43, %v2052_v45 }
 0x21c   : > { %v4785_v33 = vadd.f32 %v4569_v2, %v2054_v22 }
 0x21d   : > { %v4788_v14 = vadd.f32 %v4571_v17, %v2056_v16 }
 0x223   : > { %v2059_v19 = vpop.f32.mrb[60].mxu0 }
 0x224   : > { %v2060_v37 = vadd.f32 %v2059_v19, %v4576_v5  ;;  %v2061_v29 = vpop.f32.mrb[61].mxu0 }
 0x225   : > { %v2062_v0 = vadd.f32 %v2061_v29, %v4580_v38  ;;  %v2063_v43 = vpop.f32.mrb[62].mxu0 }
 0x226   : > { %v2064_v45 = vadd.f32 %v2063_v43, %v4576_v5  ;;  %v4798_v2 = vadd.f32 %v4578_v47, %v2060_v37  ;;  %v2065_v17 = vpop.f32.mrb[63].mxu0 }
 0x227   : > { %v2066_v22 = vadd.f32 %v2065_v17, %v4580_v38  ;;  %v4802_v16 = vadd.f32 %v4582_v60, %v2062_v0 }
 0x228   : > { %v4805_v61 = vadd.f32 %v4584_v30, %v2064_v45 }
 0x229   : > { %v4808_v19 = vadd.f32 %v4586_v63, %v2066_v22 }
 0x22b   : > { %v2102_v47 = vpop.f32.mrb[0].mxu0 }
 0x22c   : > { %v2104_v37 = vpop.f32.mrb[1].mxu0  ;;  %v3082_v17 = vadd.f32 %v2102_v47, %v4576_v5 }
 0x22d   : > { %v2106_v28 = vpop.f32.mrb[2].mxu0  ;;  %v3083_v30 = vadd.f32 %v2104_v37, %v4580_v38 }
 0x22e   : > { %v3084_v60 = vadd.f32 %v2106_v28, %v4576_v5  ;;  %v2108_v0 = vpop.f32.mrb[3].mxu0 }
 0x22f   : > { %v3085_v45 = vadd.f32 %v2108_v0, %v4580_v38 }
 0x230   : > { %v2261_v63 = vpack.c.bf16 %v3084_v60, %v3082_v17 }
 0x231   : > { %v2262_v22 = vpack.c.bf16 %v3085_v45, %v3083_v30 }
 0x233   : > { %v2112_v21 = vpop.f32.mrb[4].mxu0  ;;  %2460 = vmatprep.mubr.bf16.mxu1 %v2262_v22 }
 0x234   : > { %v2114_v29 = vpop.f32.mrb[5].mxu0  ;;  %2461 = vmatmul.mubr.bf16.vlgmr.msra.gmra.mrb[44].mxu1 %v2261_v63  ;;  %v3086_v43 = vadd.f32 %v2112_v21, %v4576_v5 }
 0x235   : > { %v2116_v52 = vpop.f32.mrb[6].mxu0  ;;  %v3087_v47 = vadd.f32 %v2114_v29, %v4580_v38 }
 0x236   : > { %v3088_v20 = vadd.f32 %v2116_v52, %v4576_v5  ;;  %v2118_v11 = vpop.f32.mrb[7].mxu0 }
 0x237   : > { %v3089_v28 = vadd.f32 %v2118_v11, %v4580_v38 }
 0x238   : > { %v2263_v1 = vpack.c.bf16 %v3088_v20, %v3086_v43 }
 0x239   : > { %v2264_v37 = vpack.c.bf16 %v3089_v28, %v3087_v47 }
 0x23b   : > { %v2122_v26 = vpop.f32.mrb[8].mxu0  ;;  %2468 = vmatprep.mubr.bf16.mxu1 %v2264_v37 }
 0x23c   : > { %v2124_v17 = vpop.f32.mrb[9].mxu0  ;;  %2469 = vmatmul.mubr.bf16.gmra.mrb[48].mxu1 %v2263_v1  ;;  %v3090_v0 = vadd.f32 %v2122_v26, %v4576_v5 }
 0x23d   : > { %v2126_v60 = vpop.f32.mrb[10].mxu0  ;;  %v3091_v21 = vadd.f32 %v2124_v17, %v4580_v38 }
 0x23e   : > { %v3092_v30 = vadd.f32 %v2126_v60, %v4576_v5  ;;  %v2128_v45 = vpop.f32.mrb[11].mxu0 }
 0x23f   : > { %v3093_v52 = vadd.f32 %v2128_v45, %v4580_v38 }
 0x240   : > { %v2265_v63 = vpack.c.bf16 %v3092_v30, %v3090_v0 }
 0x241   : > { %v2266_v29 = vpack.c.bf16 %v3093_v52, %v3091_v21 }
 0x243   : > { %v2132_v22 = vpop.f32.mrb[12].mxu0  ;;  %2476 = vmatprep.mubr.bf16.mxu1 %v2266_v29 }
 0x244   : > { %v2134_v20 = vpop.f32.mrb[13].mxu0  ;;  %2477 = vmatmul.mubr.bf16.gmra.mrb[52].mxu1 %v2265_v63  ;;  %v3094_v43 = vadd.f32 %v2132_v22, %v4576_v5 }
 0x245   : > { %v2136_v11 = vpop.f32.mrb[14].mxu0  ;;  %v3095_v26 = vadd.f32 %v2134_v20, %v4580_v38 }
 0x246   : > { %v3096_v1 = vadd.f32 %v2136_v11, %v4576_v5  ;;  %v2138_v47 = vpop.f32.mrb[15].mxu0  ;;  %v4980_v11 = vpack.c.bf16 %v4608_v23, %v4602_v50  ;;  %v4985_v50 = vpack.c.bf16 %v4645_v8, %v4638_v49  ;;  %v4988_v23 = vpack.c.bf16 %v4688_v44, %v4682_v53  ;;  %v4903_v53 = vld [vmem:[%s4958_s4] ss:$0 sm:$0xff] }
 0x247   : > { %v3097_v28 = vadd.f32 %v2138_v47, %v4580_v38  ;;  %v4993_v49 = vpack.c.bf16 %v4725_v13, %v4718_v54  ;;  %v4995_v8 = vpack.c.bf16 %v4745_v62, %v4738_v41 }
 0x248   : > { %v2267_v37 = vpack.c.bf16 %v3096_v1, %v3094_v43  ;;  %v4981_v43 = vpack.c.bf16 %v4605_v48, %v4598_v24  ;;  %v4983_v1 = vpack.c.bf16 %v4625_v55, %v4618_v57  ;;  %v4986_v24 = vpack.c.bf16 %v4668_v10, %v4662_v12 }
 0x249   : > { %v2268_v17 = vpack.c.bf16 %v3097_v28, %v3095_v26  ;;  %v4987_v48 = vpack.c.bf16 %v4665_v18, %v4658_v7  ;;  %v4989_v57 = vpack.c.bf16 %v4685_v56, %v4678_v32  ;;  %v4991_v55 = vpack.c.bf16 %v4705_v42, %v4698_v35 }
 0x24a   : > { %v4997_v7 = vpack.c.bf16 %v4765_v40, %v4758_v58  ;;  %v4998_v12 = vpack.c.bf16 %v4788_v14, %v4782_v31  ;;  %v4999_v18 = vpack.c.bf16 %v4785_v33, %v4778_v39  ;;  %v5000_v10 = vpack.c.bf16 %v4808_v19, %v4802_v16 }
 0x24b   : > { %v2142_v60 = vpop.f32.mrb[16].mxu0  ;;  %2484 = vmatprep.mubr.bf16.mxu1 %v2268_v17  ;;  %v5001_v56 = vpack.c.bf16 %v4805_v61, %v4798_v2 }
 0x24c   : > { %v2144_v0 = vpop.f32.mrb[17].mxu0  ;;  %2485 = vmatmul.mubr.bf16.gmra.mrb[56].mxu1 %v2267_v37  ;;  %v3098_v45 = vadd.f32 %v2142_v60, %v4576_v5 }
 0x24d   : > { %v2146_v30 = vpop.f32.mrb[18].mxu0  ;;  %v3099_v63 = vadd.f32 %v2144_v0, %v4580_v38 }
 0x24e   : > { %v3100_v21 = vadd.f32 %v2146_v30, %v4576_v5  ;;  %v2148_v52 = vpop.f32.mrb[19].mxu0  ;;  %v4982_v5 = vpack.c.bf16 %v4628_v4, %v4622_v3  ;;  %v4990_v3 = vpack.c.bf16 %v4708_v46, %v4702_v15  ;;  %v4992_v4 = vpack.c.bf16 %v4728_v36, %v4722_v6 }
 0x24f   : > { %v3101_v29 = vadd.f32 %v2148_v52, %v4580_v38  ;;  %v4984_v38 = vpack.c.bf16 %v4648_v51, %v4642_v9  ;;  %v4994_v9 = vpack.c.bf16 %v4748_v34, %v4742_v59  ;;  %v4996_v51 = vpack.c.bf16 %v4768_v25, %v4762_v27 }
 0x250   : > { %v2269_v22 = vpack.c.bf16 %v3100_v21, %v3098_v45 }
 0x251   : > { %v2270_v20 = vpack.c.bf16 %v3101_v29, %v3099_v63 }
 0x253   : > { %2492 = vmatprep.mubr.bf16.mxu1 %v2270_v20 }
 0x254   : > { %2493 = vmatmul.mubr.bf16.gmra.mrb[60].mxu1 %v2269_v22 }
 0x255   : > { %2500 = vmatprep.mubr.bf16.mxu1 %v4980_v11 }
 0x25c   : > { %2501 = vmatmul.mubr.bf16.gmra.mrb[64].mxu1 %v4981_v43 }
 0x25d   : > { %2508 = vmatprep.mubr.bf16.mxu1 %v4982_v5 }
 0x264   : > { %2509 = vmatmul.mubr.bf16.gmra.mrb[68].mxu1 %v4983_v1 }
 0x265   : > { %2516 = vmatprep.mubr.bf16.mxu1 %v4984_v38 }
 0x26c   : > { %2517 = vmatmul.mubr.bf16.gmra.mrb[72].mxu1 %v4985_v50 }
 0x26d   : > { %2524 = vmatprep.mubr.bf16.mxu1 %v4986_v24 }
 0x274   : > { %2525 = vmatmul.mubr.bf16.gmra.mrb[76].mxu1 %v4987_v48 }
 0x275   : > { %2532 = vmatprep.mubr.bf16.mxu1 %v4988_v23 }
 0x27c   : > { %2533 = vmatmul.mubr.bf16.gmra.mrb[80].mxu1 %v4989_v57 }
 0x27d   : > { %2540 = vmatprep.mubr.bf16.mxu1 %v4990_v3 }
 0x284   : > { %2541 = vmatmul.mubr.bf16.gmra.mrb[84].mxu1 %v4991_v55 }
 0x285   : > { %2548 = vmatprep.mubr.bf16.mxu1 %v4992_v4 }
 0x28c   : > { %2549 = vmatmul.mubr.bf16.gmra.mrb[88].mxu1 %v4993_v49 }
 0x28d   : > { %2556 = vmatprep.mubr.bf16.mxu1 %v4994_v9 }
 0x294   : > { %2557 = vmatmul.mubr.bf16.gmra.mrb[92].mxu1 %v4995_v8 }
 0x295   : > { %2564 = vmatprep.mubr.bf16.mxu1 %v4996_v51 }
 0x29c   : > { %2565 = vmatmul.mubr.bf16.gmra.mrb[96].mxu1 %v4997_v7 }
 0x29d   : > { %2572 = vmatprep.mubr.bf16.mxu1 %v4998_v12 }
 0x2a4   : > { %2573 = vmatmul.mubr.bf16.gmra.mrb[100].mxu1 %v4999_v18 }
 0x2a5   : > { %2580 = vmatprep.mubr.bf16.mxu1 %v5000_v10 }
 0x2ac   : > { %2581 = vmatmul.mubr.bf16.gmra.mrb[104].mxu1 %v5001_v56 }
 0x307   : > { %v2982_v32 = vpop.f32.mrb[44].mxu1 }
 0x308   : > { %v2983_v44 = vpop.f32.mrb[45].mxu1 }
 0x309   : > { %v2984_v42 = vadd.f32 %v2983_v44, %v2982_v32  ;;  %v2985_v35 = vpop.f32.mrb[46].mxu1 }
 0x30a   : > { %v2986_v15 = vpop.f32.mrb[47].mxu1 }
 0x30b   : > { %v2463_v46 = vadd.f32 %v2984_v42, %v4903_v53  ;;  %v2987_v13 = vadd.f32 %v2986_v15, %v2985_v35 }
 0x30d   : > { %2589 = vxpose.xlu0.b32.start [1/16] (narrow) %v2463_v46, 24  ;;  %v2466_v54 = vadd.f32 %v2987_v13, %v4903_v53 }
 0x30f   : > { %v2988_v6 = vpop.f32.mrb[48].mxu1 }
 0x310   : > { %v2989_v36 = vpop.f32.mrb[49].mxu1 }
 0x311   : > { %v2990_v62 = vadd.f32 %v2989_v36, %v2988_v6  ;;  %v2991_v41 = vpop.f32.mrb[50].mxu1  ;;  %2590 = vxpose.xlu0.b32.cont [2/16] (narrow) %v2466_v54, 24 }
 0x312   : > { %v2992_v59 = vpop.f32.mrb[51].mxu1 }
 0x313   : > { %v2471_v34 = vadd.f32 %v2990_v62, %v4903_v53  ;;  %v2993_v40 = vadd.f32 %v2992_v59, %v2991_v41 }
 0x315   : > { %2591 = vxpose.xlu0.b32.cont [3/16] (narrow) %v2471_v34, 24  ;;  %v2474_v58 = vadd.f32 %v2993_v40, %v4903_v53 }
 0x317   : > { %v2994_v27 = vpop.f32.mrb[52].mxu1 }
 0x318   : > { %v2995_v25 = vpop.f32.mrb[53].mxu1 }
 0x319   : > { %v2996_v33 = vadd.f32 %v2995_v25, %v2994_v27  ;;  %v2997_v39 = vpop.f32.mrb[54].mxu1  ;;  %2592 = vxpose.xlu0.b32.cont [4/16] (narrow) %v2474_v58, 24 }
 0x31a   : > { %v2998_v31 = vpop.f32.mrb[55].mxu1 }
 0x31b   : > { %v2479_v14 = vadd.f32 %v2996_v33, %v4903_v53  ;;  %v2999_v61 = vadd.f32 %v2998_v31, %v2997_v39 }
 0x31d   : > { %2593 = vxpose.xlu0.b32.cont [5/16] (narrow) %v2479_v14, 24  ;;  %v2482_v2 = vadd.f32 %v2999_v61, %v4903_v53 }
 0x31f   : > { %v3000_v16 = vpop.f32.mrb[56].mxu1 }
 0x320   : > { %v3001_v19 = vpop.f32.mrb[57].mxu1 }
 0x321   : > { %v3002_v47 = vadd.f32 %v3001_v19, %v3000_v16  ;;  %v3003_v26 = vpop.f32.mrb[58].mxu1  ;;  %2594 = vxpose.xlu0.b32.cont [6/16] (narrow) %v2482_v2, 24 }
 0x322   : > { %v3004_v28 = vpop.f32.mrb[59].mxu1 }
 0x323   : > { %v2487_v37 = vadd.f32 %v3002_v47, %v4903_v53  ;;  %v3005_v17 = vadd.f32 %v3004_v28, %v3003_v26 }
 0x325   : > { %2595 = vxpose.xlu0.b32.cont [7/16] (narrow) %v2487_v37, 24  ;;  %v2490_v60 = vadd.f32 %v3005_v17, %v4903_v53 }
 0x327   : > { %v3006_v0 = vpop.f32.mrb[60].mxu1 }
 0x328   : > { %v3007_v30 = vpop.f32.mrb[61].mxu1 }
 0x329   : > { %v3008_v45 = vadd.f32 %v3007_v30, %v3006_v0  ;;  %v3009_v21 = vpop.f32.mrb[62].mxu1  ;;  %2596 = vxpose.xlu0.b32.cont [8/16] (narrow) %v2490_v60, 24 }
 0x32a   : > { %v3010_v52 = vpop.f32.mrb[63].mxu1 }
 0x32b   : > { %v2495_v63 = vadd.f32 %v3008_v45, %v4903_v53  ;;  %v3011_v29 = vadd.f32 %v3010_v52, %v3009_v21 }
 0x32d   : > { %2597 = vxpose.xlu0.b32.cont [9/16] (narrow) %v2495_v63, 24  ;;  %v2498_v22 = vadd.f32 %v3011_v29, %v4903_v53 }
 0x32f   : > { %v3012_v20 = vpop.f32.mrb[64].mxu1 }
 0x330   : > { %v3013_v11 = vpop.f32.mrb[65].mxu1 }
 0x331   : > { %v3014_v43 = vadd.f32 %v3013_v11, %v3012_v20  ;;  %v3015_v5 = vpop.f32.mrb[66].mxu1  ;;  %2598 = vxpose.xlu0.b32.cont [10/16] (narrow) %v2498_v22, 24 }
 0x332   : > { %v3016_v1 = vpop.f32.mrb[67].mxu1 }
 0x333   : > { %v2503_v38 = vadd.f32 %v3014_v43, %v4903_v53  ;;  %v3017_v50 = vadd.f32 %v3016_v1, %v3015_v5 }
 0x335   : > { %2599 = vxpose.xlu0.b32.cont [11/16] (narrow) %v2503_v38, 24  ;;  %v2506_v24 = vadd.f32 %v3017_v50, %v4903_v53 }
 0x337   : > { %v3018_v48 = vpop.f32.mrb[68].mxu1 }
 0x338   : > { %v3019_v23 = vpop.f32.mrb[69].mxu1 }
 0x339   : > { %v3020_v57 = vadd.f32 %v3019_v23, %v3018_v48  ;;  %v3021_v3 = vpop.f32.mrb[70].mxu1  ;;  %2600 = vxpose.xlu0.b32.cont [12/16] (narrow) %v2506_v24, 24 }
 0x33a   : > { %v3022_v55 = vpop.f32.mrb[71].mxu1 }
 0x33b   : > { %v2511_v4 = vadd.f32 %v3020_v57, %v4903_v53  ;;  %v3023_v49 = vadd.f32 %v3022_v55, %v3021_v3 }
 0x33d   : > { %2601 = vxpose.xlu0.b32.cont [13/16] (narrow) %v2511_v4, 24  ;;  %v2514_v9 = vadd.f32 %v3023_v49, %v4903_v53 }
 0x33f   : > { %v3024_v8 = vpop.f32.mrb[72].mxu1 }
 0x340   : > { %v3025_v51 = vpop.f32.mrb[73].mxu1 }
 0x341   : > { %v3026_v7 = vadd.f32 %v3025_v51, %v3024_v8  ;;  %v3027_v12 = vpop.f32.mrb[74].mxu1  ;;  %2602 = vxpose.xlu0.b32.cont [14/16] (narrow) %v2514_v9, 24 }
 0x342   : > { %v3028_v18 = vpop.f32.mrb[75].mxu1 }
 0x343   : > { %v2519_v10 = vadd.f32 %v3026_v7, %v4903_v53  ;;  %v3029_v56 = vadd.f32 %v3028_v18, %v3027_v12 }
 0x345   : > { %2603 = vxpose.xlu0.b32.cont [15/16] (narrow) %v2519_v10, 24  ;;  %v2522_v32 = vadd.f32 %v3029_v56, %v4903_v53 }
 0x347   : > { %v3030_v44 = vpop.f32.mrb[76].mxu1 }
 0x348   : > { %v3031_v42 = vpop.f32.mrb[77].mxu1 }
 0x349   : > { %v3032_v35 = vadd.f32 %v3031_v42, %v3030_v44  ;;  %v3033_v15 = vpop.f32.mrb[78].mxu1  ;;  %2604 = vxpose.xlu0.b32.end [16/16] (narrow) %v2522_v32, 24 }
 0x34a   : > { %v3034_v46 = vpop.f32.mrb[79].mxu1 }
 0x34b   : > { %v2527_v13 = vadd.f32 %v3032_v35, %v4903_v53  ;;  %v3035_v54 = vadd.f32 %v3034_v46, %v3033_v15 }
 0x34d   : > { %2621 = vxpose.xlu1.b32.start [1/16] (narrow) %v2527_v13, 24  ;;  %v2530_v6 = vadd.f32 %v3035_v54, %v4903_v53 }
 0x34f   : > { %v3036_v36 = vpop.f32.mrb[80].mxu1 }
 0x350   : > { %v3037_v62 = vpop.f32.mrb[81].mxu1 }
 0x351   : > { %v3038_v41 = vadd.f32 %v3037_v62, %v3036_v36  ;;  %v3039_v59 = vpop.f32.mrb[82].mxu1  ;;  %2622 = vxpose.xlu1.b32.cont [2/16] (narrow) %v2530_v6, 24 }
 0x352   : > { %v3040_v34 = vpop.f32.mrb[83].mxu1 }
 0x353   : > { %v2535_v40 = vadd.f32 %v3038_v41, %v4903_v53  ;;  %v3041_v58 = vadd.f32 %v3040_v34, %v3039_v59 }
 0x355   : > { %2623 = vxpose.xlu1.b32.cont [3/16] (narrow) %v2535_v40, 24  ;;  %v2538_v27 = vadd.f32 %v3041_v58, %v4903_v53 }
 0x357   : > { %v3042_v25 = vpop.f32.mrb[84].mxu1 }
 0x358   : > { %v3043_v33 = vpop.f32.mrb[85].mxu1 }
 0x359   : > { %v3044_v39 = vadd.f32 %v3043_v33, %v3042_v25  ;;  %v3045_v31 = vpop.f32.mrb[86].mxu1  ;;  %2624 = vxpose.xlu1.b32.cont [4/16] (narrow) %v2538_v27, 24 }
 0x35a   : > { %v3046_v14 = vpop.f32.mrb[87].mxu1 }
 0x35b   : > { %v2543_v61 = vadd.f32 %v3044_v39, %v4903_v53  ;;  %v3047_v2 = vadd.f32 %v3046_v14, %v3045_v31 }
 0x35d   : > { %2625 = vxpose.xlu1.b32.cont [5/16] (narrow) %v2543_v61, 24  ;;  %v2546_v16 = vadd.f32 %v3047_v2, %v4903_v53 }
 0x35f   : > { %v3048_v19 = vpop.f32.mrb[88].mxu1 }
 0x360   : > { %v3049_v47 = vpop.f32.mrb[89].mxu1 }
 0x361   : > { %v3050_v26 = vadd.f32 %v3049_v47, %v3048_v19  ;;  %v3051_v28 = vpop.f32.mrb[90].mxu1  ;;  %2626 = vxpose.xlu1.b32.cont [6/16] (narrow) %v2546_v16, 24 }
 0x362   : > { %v3052_v37 = vpop.f32.mrb[91].mxu1 }
 0x363   : > { %v2551_v17 = vadd.f32 %v3050_v26, %v4903_v53  ;;  %v3053_v60 = vadd.f32 %v3052_v37, %v3051_v28 }
 0x365   : > { %2627 = vxpose.xlu1.b32.cont [7/16] (narrow) %v2551_v17, 24  ;;  %v2554_v0 = vadd.f32 %v3053_v60, %v4903_v53 }
 0x367   : > { %v3054_v30 = vpop.f32.mrb[92].mxu1 }
 0x368   : > { %v3055_v45 = vpop.f32.mrb[93].mxu1 }
 0x369   : > { %v3056_v21 = vadd.f32 %v3055_v45, %v3054_v30  ;;  %v3057_v52 = vpop.f32.mrb[94].mxu1  ;;  %2628 = vxpose.xlu1.b32.cont [8/16] (narrow) %v2554_v0, 24 }
 0x36a   : > { %v3058_v63 = vpop.f32.mrb[95].mxu1 }
 0x36b   : > { %v2559_v29 = vadd.f32 %v3056_v21, %v4903_v53  ;;  %v3059_v22 = vadd.f32 %v3058_v63, %v3057_v52 }
 0x36d   : > { %2629 = vxpose.xlu1.b32.cont [9/16] (narrow) %v2559_v29, 24  ;;  %v2562_v20 = vadd.f32 %v3059_v22, %v4903_v53 }
 0x36f   : > { %v3060_v11 = vpop.f32.mrb[96].mxu1 }
 0x370   : > { %v3061_v43 = vpop.f32.mrb[97].mxu1 }
 0x371   : > { %v3062_v5 = vadd.f32 %v3061_v43, %v3060_v11  ;;  %v3063_v1 = vpop.f32.mrb[98].mxu1  ;;  %2630 = vxpose.xlu1.b32.cont [10/16] (narrow) %v2562_v20, 24 }
 0x372   : > { %v3064_v38 = vpop.f32.mrb[99].mxu1 }
 0x373   : > { %v2567_v50 = vadd.f32 %v3062_v5, %v4903_v53  ;;  %v3065_v24 = vadd.f32 %v3064_v38, %v3063_v1 }
 0x375   : > { %2631 = vxpose.xlu1.b32.cont [11/16] (narrow) %v2567_v50, 24  ;;  %v2570_v48 = vadd.f32 %v3065_v24, %v4903_v53 }
 0x377   : > { %v3066_v23 = vpop.f32.mrb[100].mxu1 }
 0x378   : > { %v3067_v57 = vpop.f32.mrb[101].mxu1 }
 0x379   : > { %v3068_v3 = vadd.f32 %v3067_v57, %v3066_v23  ;;  %v3069_v55 = vpop.f32.mrb[102].mxu1  ;;  %2632 = vxpose.xlu1.b32.cont [12/16] (narrow) %v2570_v48, 24 }
 0x37a   : > { %v3070_v4 = vpop.f32.mrb[103].mxu1 }
 0x37b   : > { %v2575_v49 = vadd.f32 %v3068_v3, %v4903_v53  ;;  %v3071_v9 = vadd.f32 %v3070_v4, %v3069_v55 }
 0x37d   : > { %2633 = vxpose.xlu1.b32.cont [13/16] (narrow) %v2575_v49, 24  ;;  %v2578_v8 = vadd.f32 %v3071_v9, %v4903_v53 }
 0x37f   : > { %v3072_v51 = vpop.f32.mrb[104].mxu1 }
 0x380   : > { %v3073_v7 = vpop.f32.mrb[105].mxu1 }
 0x381   : > { %v3074_v12 = vadd.f32 %v3073_v7, %v3072_v51  ;;  %2634 = vxpose.xlu1.b32.cont [14/16] (narrow) %v2578_v8, 24  ;;  %v3075_v18 = vpop.f32.mrb[106].mxu1 }
 0x382   : > { %v3076_v10 = vpop.f32.mrb[107].mxu1 }
 0x383   : > { %v2583_v56 = vadd.f32 %v3074_v12, %v4903_v53  ;;  %v3077_v32 = vadd.f32 %v3076_v10, %v3075_v18 }
 0x385   : > { %2635 = vxpose.xlu1.b32.cont [15/16] (narrow) %v2583_v56, 24  ;;  %v2586_v44 = vadd.f32 %v3077_v32, %v4903_v53 }
 0x389   : > { %2636 = vxpose.xlu1.b32.end [16/16] (narrow) %v2586_v44, 24 }
 0x38d   : > { %v2605_v42 = vpop.trf.xlu0 }
 0x38e   : > { %2653 = vst [vmem:[%s301_s11] sm:$0xff] %v2605_v42 }
 0x391   : > { %v2606_v35 = vpop.trf.xlu0 }
 0x392   : > { %2655 = vst [vmem:[%s301_s11 + $0x10] sm:$0xff] %v2606_v35 }
 0x395   : > { %v2607_v15 = vpop.trf.xlu0 }
 0x396   : > { %2657 = vst [vmem:[%s301_s11 + $0x20] sm:$0x3] %v2607_v15 }
 0x3cd   : > { %v2637_v46 = vpop.trf.xlu1 }
 0x3ce   : > { %2654 = vst [vmem:[%s301_s11 + $0x8] sm:$0xff] %v2637_v46 }
 0x3d1   : > { %v2638_v13 = vpop.trf.xlu1 }
 0x3d2   : > { %2656 = vst [vmem:[%s301_s11 + $0x18] sm:$0xff] %v2638_v13 }
 0x3d5   : > { %v2639_v53 = vpop.trf.xlu1 }
 0x3d6   : > { %2658 = vst [vmem:[%s301_s11 + $0x28] sm:$0x3] %v2639_v53  ;;  %v2661_v54 = vcombine.low %v2607_v15, %v2639_v53  ;;  %v2662_v6 = vcombine.high %v2607_v15, %v2639_v53 }
 0x3d8   : > { %v2962_v36 = vrot.slane %v2661_v54, 10  ;;  %v2668_v62 = vrot.slane %v2662_v6, 6 }
 0x3da   : > { %v2669_v41 = vsel %vm2665_vm11, %v2962_v36, %v2668_v62 }
 0x3db   : > { %2671 = vst [vmem:[%s311_s27] sm:$0x77] %v2669_v41 }
 0x3dc PF: > { %s17_s23 = sadd.s32 1, %s3352_s23   ;;  %s5002_s21 = smov %s3348_s22 }
 0x3dd   : > { %p14_p5 = scmp.ge.s32.totalorder %s17_s23, 4   ;;  %s5003_s22 = smov %s5005_s24 }
 0x3df   :  { %16 = sbr.rel (!%p14_p5) target bundleno = 2 (0x2), region = 82 }

</bundles_post_ra>
